<compile_context>
chip_gen: v7x
topology: tpu7x:2x2x1
jax: 0.10.0
libtpu: 0.0.40
codegen_flags: <defaults>
</compile_context>

<pallas_src>
import functools

import jax
import jax.numpy as jnp
from jax.experimental import pallas as pl
from jax.experimental.pallas import tpu as pltpu


def _pixel_shuffle_kernel(x_ref, o_ref, *, scale, W, D, Th):
    """x_ref: (1, s**3, Th, W*D)  ->  o_ref: (1, 1, Th*s, W*s*D*s)."""
    s = scale
    L = W * s * D * s
    xb = x_ref[...]                                    # (1, s^3, Th, W*D)

    row_slabs = []                                     # per sh: (Th, 1, L)
    for sh in range(s):
        sw_slabs = []                                  # per sw: (W, 1, D*s, Th)
        for sw in range(s):
            sd_slabs = []                              # per sd: (W, D, 1, Th)
            for sd in range(s):
                ch = (sh * s + sw) * s + sd
                # (Th, W*D) -> (W*D, Th): Th on lanes, (w, d) on sublanes.
                t = xb[0, ch].T
                sd_slabs.append(t.reshape(W, D, 1, Th))
            # depth interleave (sublane-side concat): rows ordered d*s + sd
            g = jnp.concatenate(sd_slabs, axis=2)      # (W, D, s, Th)
            sw_slabs.append(g.reshape(W, 1, D * s, Th))
        # width interleave: rows ordered w (outer), sw, then d*s + sd (inner)
        gsh = jnp.concatenate(sw_slabs, axis=1)        # (W, s, D*s, Th)
        gsh = gsh.reshape(L, Th)                       # rows = (w, sw, d, sd)
        # one transpose per sh: lanes become the flat (w, sw, d, sd) index
        row_slabs.append(gsh.T.reshape(Th, 1, L))      # (Th, 1, L)
    # height interleave: output rows ordered th*s + sh
    out = jnp.concatenate(row_slabs, axis=1)           # (Th, s, L)
    o_ref[0, 0, :, :] = out.reshape(Th * s, L)


def _choose_th(H, bytes_per_row, budget_bytes):
    """Largest divisor of H whose block fits budget; prefer Th == H or Th % 8 == 0
    so the second-to-last block dims stay sublane-aligned."""
    divisors = [d for d in range(1, H + 1) if H % d == 0]
    aligned = [d for d in divisors if d == H or d % 8 == 0]
    for cands in (aligned, divisors):
        for d in sorted(cands, reverse=True):
            if d * bytes_per_row <= budget_bytes:
                return d
    return 1


def pixel_shuffle(x, scale):
    B, C, H, W, D = x.shape
    s = scale
    assert C % (s ** 3) == 0, "in_channels must be divisible by scale**3"
    Cout = C // (s ** 3)
    L = W * s * D * s
    itemsize = jnp.dtype(x.dtype).itemsize

    # Per-generation VMEM budget: v5e/v6e have 128 MiB, v7x only 64 MiB.
    try:
        vmem_cap = int(pltpu.get_tpu_info().vmem_capacity_bytes)
    except Exception:
        vmem_cap = 64 * 1024 * 1024                    # conservative fallback
    vmem_limit = min((vmem_cap * 3) // 4, 96 * 1024 * 1024)

    # One grid step touches Th input rows (= Th*s output rows) of one output
    # channel; input block == output block == s^3*Th*W*D elements.  Leave room
    # for double-buffered in+out blocks plus in-kernel temporaries.
    bytes_per_row = (s ** 3) * W * D * itemsize
    Th = _choose_th(H, bytes_per_row, vmem_limit // 12)

    # Free reshape: merge the two trailing dims so the kernel sees a lane-dense
    # flat (w, d) axis and emits lane-dense flat output rows of length W*s*D*s.
    x2 = x.reshape(B, C, H, W * D)

    kernel = functools.partial(_pixel_shuffle_kernel, scale=s, W=W, D=D, Th=Th)

    out_flat = pl.pallas_call(
        kernel,
        out_shape=jax.ShapeDtypeStruct((B, Cout, H * s, L), x.dtype),
        grid_spec=pltpu.PrefetchScalarGridSpec(
            num_scalar_prefetch=0,
            grid=(B, Cout, H // Th),
            in_specs=[
                pl.BlockSpec((1, s ** 3, Th, W * D),
                             lambda b, c, h: (b, c, h, 0)),
            ],
            out_specs=pl.BlockSpec((1, 1, Th * s, L),
                                   lambda b, c, h: (b, c, h, 0)),
        ),
        compiler_params=pltpu.CompilerParams(
            dimension_semantics=("parallel", "parallel", "parallel"),
            vmem_limit_bytes=vmem_limit),
        cost_estimate=pl.CostEstimate(
            flops=0, transcendentals=0,
            bytes_accessed=2 * x.size * itemsize),
    )(x2)

    # Free reshape: split the flat lane dim back into (W*s, D*s).
    return out_flat.reshape(B, Cout, H * s, W * s, D * s)


def pixel_shuffle_ref(x, scale):
    """Pure-JAX reference replicating the PyTorch forward exactly."""
    B, C, H, W, D = x.shape
    s = scale
    Cout = C // (s ** 3)
    xv = x.reshape(B, Cout, s, s, s, H, W, D)
    out = jnp.transpose(xv, (0, 1, 5, 2, 6, 3, 7, 4))
    return out.reshape(B, Cout, H * s, W * s, D * s)


if __name__ == "__main__":
    key = jax.random.PRNGKey(0)
    k1, k2 = jax.random.split(key)

    # Config 1: the original tiny smoke-test shape.
    scale = 2
    B, Cout, H, W, D = 2, 2, 4, 4, 8
    C = Cout * scale ** 3
    x1 = jax.random.normal(k1, (B, C, H, W, D), dtype=jnp.float32)
    out1 = jax.block_until_ready(pixel_shuffle(x1, scale))
    ref1 = pixel_shuffle_ref(x1, scale)
    assert out1.shape == (B, Cout, H * scale, W * scale, D * scale), out1.shape
    assert jnp.array_equal(out1, ref1), "pixel shuffle mismatch (config 1)"

    # Config 2: larger spatial dims -> fully lane-dense flat rows (W*s*D*s = 512).
    scale = 2
    B, Cout, H, W, D = 1, 1, 8, 8, 16
    C = Cout * scale ** 3
    x2 = jax.random.normal(k2, (B, C, H, W, D), dtype=jnp.float32)
    out2 = jax.block_until_ready(pixel_shuffle(x2, scale))
    ref2 = pixel_shuffle_ref(x2, scale)
    assert out2.shape == ref2.shape, out2.shape
    assert jnp.array_equal(out2, ref2), "pixel shuffle mismatch (config 2)"

    print("KERNEL_OK")
</pallas_src>

<mosaic_0001>
module attributes {stable_mosaic.version = 11 : i64} {
  func.func @_pixel_shuffle_kernel(%arg0: i32, %arg1: i32, %arg2: i32, %arg3: memref<1x8x4x32xf32, #tpu.memory_space<vmem>>, %arg4: memref<1x1x8x128xf32, #tpu.memory_space<vmem>>) attributes {dimension_semantics = [#tpu.dimension_semantics<parallel>, #tpu.dimension_semantics<parallel>, #tpu.dimension_semantics<parallel>], iteration_bounds = array<i64: 2, 2, 1>, scalar_prefetch = 0 : i64, scratch_operands = 0 : i64, tpu.core_type = #tpu.core_type<tc>, window_params = [{transform_indices = @transform_0, window_bounds = array<i64: 1, 8, 4, 32>}, {transform_indices = @transform_1, window_bounds = array<i64: 1, 1, 8, 128>}]} {
    %c0 = arith.constant 0 : index
    %c0_0 = arith.constant 0 : index
    %c0_1 = arith.constant 0 : index
    %c0_2 = arith.constant 0 : index
    %0 = vector.load %arg3[%c0, %c0_0, %c0_1, %c0_2] : memref<1x8x4x32xf32, #tpu.memory_space<vmem>>, vector<1x8x4x32xf32>
    %1 = vector.extract_strided_slice %0 {offsets = [0, 0, 0, 0], sizes = [1, 1, 4, 32], strides = [1, 1, 1, 1]} : vector<1x8x4x32xf32> to vector<1x1x4x32xf32>
    %2 = vector.shape_cast %1 : vector<1x1x4x32xf32> to vector<4x32xf32>
    %3 = tpu.transpose %2, [1, 0] : vector<4x32xf32> -> vector<32x4xf32>
    %4 = vector.shape_cast %3 : vector<32x4xf32> to vector<4x8x1x4xf32>
    %5 = vector.extract_strided_slice %0 {offsets = [0, 1, 0, 0], sizes = [1, 1, 4, 32], strides = [1, 1, 1, 1]} : vector<1x8x4x32xf32> to vector<1x1x4x32xf32>
    %6 = vector.shape_cast %5 : vector<1x1x4x32xf32> to vector<4x32xf32>
    %7 = tpu.transpose %6, [1, 0] : vector<4x32xf32> -> vector<32x4xf32>
    %8 = vector.shape_cast %7 : vector<32x4xf32> to vector<4x8x1x4xf32>
    %9 = tpu.concatenate %4, %8 in 2 : vector<4x8x1x4xf32>, vector<4x8x1x4xf32> -> vector<4x8x2x4xf32>
    %10 = vector.shape_cast %9 : vector<4x8x2x4xf32> to vector<4x1x16x4xf32>
    %11 = vector.extract_strided_slice %0 {offsets = [0, 2, 0, 0], sizes = [1, 1, 4, 32], strides = [1, 1, 1, 1]} : vector<1x8x4x32xf32> to vector<1x1x4x32xf32>
    %12 = vector.shape_cast %11 : vector<1x1x4x32xf32> to vector<4x32xf32>
    %13 = tpu.transpose %12, [1, 0] : vector<4x32xf32> -> vector<32x4xf32>
    %14 = vector.shape_cast %13 : vector<32x4xf32> to vector<4x8x1x4xf32>
    %15 = vector.extract_strided_slice %0 {offsets = [0, 3, 0, 0], sizes = [1, 1, 4, 32], strides = [1, 1, 1, 1]} : vector<1x8x4x32xf32> to vector<1x1x4x32xf32>
    %16 = vector.shape_cast %15 : vector<1x1x4x32xf32> to vector<4x32xf32>
    %17 = tpu.transpose %16, [1, 0] : vector<4x32xf32> -> vector<32x4xf32>
    %18 = vector.shape_cast %17 : vector<32x4xf32> to vector<4x8x1x4xf32>
    %19 = tpu.concatenate %14, %18 in 2 : vector<4x8x1x4xf32>, vector<4x8x1x4xf32> -> vector<4x8x2x4xf32>
    %20 = vector.shape_cast %19 : vector<4x8x2x4xf32> to vector<4x1x16x4xf32>
    %21 = tpu.concatenate %10, %20 in 1 : vector<4x1x16x4xf32>, vector<4x1x16x4xf32> -> vector<4x2x16x4xf32>
    %22 = vector.shape_cast %21 : vector<4x2x16x4xf32> to vector<128x4xf32>
    %23 = tpu.transpose %22, [1, 0] : vector<128x4xf32> -> vector<4x128xf32>
    %24 = vector.shape_cast %23 : vector<4x128xf32> to vector<4x1x128xf32>
    %25 = vector.extract_strided_slice %0 {offsets = [0, 4, 0, 0], sizes = [1, 1, 4, 32], strides = [1, 1, 1, 1]} : vector<1x8x4x32xf32> to vector<1x1x4x32xf32>
    %26 = vector.shape_cast %25 : vector<1x1x4x32xf32> to vector<4x32xf32>
    %27 = tpu.transpose %26, [1, 0] : vector<4x32xf32> -> vector<32x4xf32>
    %28 = vector.shape_cast %27 : vector<32x4xf32> to vector<4x8x1x4xf32>
    %29 = vector.extract_strided_slice %0 {offsets = [0, 5, 0, 0], sizes = [1, 1, 4, 32], strides = [1, 1, 1, 1]} : vector<1x8x4x32xf32> to vector<1x1x4x32xf32>
    %30 = vector.shape_cast %29 : vector<1x1x4x32xf32> to vector<4x32xf32>
    %31 = tpu.transpose %30, [1, 0] : vector<4x32xf32> -> vector<32x4xf32>
    %32 = vector.shape_cast %31 : vector<32x4xf32> to vector<4x8x1x4xf32>
    %33 = tpu.concatenate %28, %32 in 2 : vector<4x8x1x4xf32>, vector<4x8x1x4xf32> -> vector<4x8x2x4xf32>
    %34 = vector.shape_cast %33 : vector<4x8x2x4xf32> to vector<4x1x16x4xf32>
    %35 = vector.extract_strided_slice %0 {offsets = [0, 6, 0, 0], sizes = [1, 1, 4, 32], strides = [1, 1, 1, 1]} : vector<1x8x4x32xf32> to vector<1x1x4x32xf32>
    %36 = vector.shape_cast %35 : vector<1x1x4x32xf32> to vector<4x32xf32>
    %37 = tpu.transpose %36, [1, 0] : vector<4x32xf32> -> vector<32x4xf32>
    %38 = vector.shape_cast %37 : vector<32x4xf32> to vector<4x8x1x4xf32>
    %39 = vector.extract_strided_slice %0 {offsets = [0, 7, 0, 0], sizes = [1, 1, 4, 32], strides = [1, 1, 1, 1]} : vector<1x8x4x32xf32> to vector<1x1x4x32xf32>
    %40 = vector.shape_cast %39 : vector<1x1x4x32xf32> to vector<4x32xf32>
    %41 = tpu.transpose %40, [1, 0] : vector<4x32xf32> -> vector<32x4xf32>
    %42 = vector.shape_cast %41 : vector<32x4xf32> to vector<4x8x1x4xf32>
    %43 = tpu.concatenate %38, %42 in 2 : vector<4x8x1x4xf32>, vector<4x8x1x4xf32> -> vector<4x8x2x4xf32>
    %44 = vector.shape_cast %43 : vector<4x8x2x4xf32> to vector<4x1x16x4xf32>
    %45 = tpu.concatenate %34, %44 in 1 : vector<4x1x16x4xf32>, vector<4x1x16x4xf32> -> vector<4x2x16x4xf32>
    %46 = vector.shape_cast %45 : vector<4x2x16x4xf32> to vector<128x4xf32>
    %47 = tpu.transpose %46, [1, 0] : vector<128x4xf32> -> vector<4x128xf32>
    %48 = vector.shape_cast %47 : vector<4x128xf32> to vector<4x1x128xf32>
    %49 = tpu.concatenate %24, %48 in 1 : vector<4x1x128xf32>, vector<4x1x128xf32> -> vector<4x2x128xf32>
    %50 = vector.shape_cast %49 : vector<4x2x128xf32> to vector<8x128xf32>
    %c0_3 = arith.constant 0 : index
    %c0_4 = arith.constant 0 : index
    %c0_5 = arith.constant 0 : index
    %c0_6 = arith.constant 0 : index
    %51 = vector.load %arg4[%c0_3, %c0_4, %c0_5, %c0_6] : memref<1x1x8x128xf32, #tpu.memory_space<vmem>>, vector<1x1x8x128xf32>
    %52 = vector.shape_cast %51 : vector<1x1x8x128xf32> to vector<8x128xf32>
    %53 = vector.shape_cast %50 : vector<8x128xf32> to vector<1x1x8x128xf32>
    tpu.vector_store %arg4[%c0_3, %c0_4, %c0_5, %c0_6], %53 {strides = array<i32>} : memref<1x1x8x128xf32, #tpu.memory_space<vmem>>, vector<1x1x8x128xf32>,
    return
  }
  func.func @transform_0(%arg0: i32, %arg1: i32, %arg2: i32) -> (i32, i32, i32, i32) {
    %c0_i32 = arith.constant 0 : i32
    %c0_i32_0 = arith.constant 0 : i32
    return %arg0, %arg1, %arg2, %c0_i32 : i32, i32, i32, i32
  }
  func.func @transform_1(%arg0: i32, %arg1: i32, %arg2: i32) -> (i32, i32, i32, i32) {
    %c0_i32 = arith.constant 0 : i32
    %c0_i32_0 = arith.constant 0 : i32
    return %arg0, %arg1, %arg2, %c0_i32 : i32, i32, i32, i32
  }
}

</mosaic_0001>

<bundles_post_ra>
// kernel: tpu_custom_call.1
= control target key start
LH: loop header
LB: loop body
LE: loop exit
PB: predicated region body
PF: predicated region fallthrough
CT: control target
= control target key end

     0   :  { %6 = vsyncpa [#allocation3], 0  ;;  %s6084_s0 = inlined_call_operand.hbm [shape: f32[2,16,4,32], index: 0, kind: input, shape index: {}]   ;;  %s6085_s1 = inlined_call_operand.hbm [shape: f32[2,2,8,128], index: 1, kind: output, shape index: {}]  }
   0x1   :  { %8 = vsyncpa [#allocation3 + $0x1], 0 }
   0x2   :  { %9 = vsyncpa [#allocation4], 0 }
   0x3   :  { %11 = vsyncpa [#allocation4 + $0x1], 0  ;;  %s4149_s6 = smov 0   ;;  %s4151_s7 = smov 0  }
   0x4   :  { %s4153_s8 = smov 0   ;;  %s4155_s9 = smov 0  }
   0x5   :  { %s4157_s10 = smov 0   ;;  %s4159_s11 = smov 0  }
   0x6   :  { %s4161_s12 = smov 0   ;;  %s4163_s13 = smov 0  }
   0x7 LB: > { %s3904_s14 = sadd.s32 4294967295, %s4131_s13   ;;  %s3905_s15 = sadd.s32 4294967294, %s4131_s13   ;;  %s4131_s13 = sphi %s4163_s13, %s17_s13   ;;  %s4127_s12 = sphi %s4161_s12, %s6541_s12   ;;  %s4123_s11 = sphi %s4159_s11, %s6540_s11   ;;  %s4119_s10 = sphi %s4157_s10, %s6539_s10   ;;  %s4115_s9 = sphi %s4155_s9, %s6538_s9   ;;  %s4111_s8 = sphi %s4153_s8, %s6537_s8   ;;  %s4107_s7 = sphi %s4151_s7, %s6536_s7   ;;  %s4103_s6 = sphi %s4149_s6, %s6535_s6  }
   0x8   : > { %s32_s16 = sadd.s32 1, %s4123_s11  ;;  %s36_s17 = sadd.s32 1, %s4127_s12 }
   0x9   : > { %p34_p0 = scmp.ge.s32.totalorder %s32_s16, 2  ;;  %s47_s18 = sadd.s32 1, %s4111_s8 }
   0xa   : > { %p54_p1 = scmp.ne.s32.totalorder %s4111_s8, %s4107_s7  ;;  %p55_p2 = scmp.eq.s32.totalorder %s4131_s13, 0 }
   0xb   : > { %s6543_s16 = smov (%p34_p0, %s32_s16), 0  ;;  %s6545_s17 = smov (!%p34_p0, %s36_s17), %s4127_s12 }
   0xc   : > { %s41_s19 = ssub.s32 %s4123_s11, %s6543_s16  ;;  %p4202_p3 = por %p55_p2, %p54_p1 }
   0xd   : > { %p38_p4 = scmp.ge.s32.totalorder %s6545_s17, 2  ;;  %p60_p5 = scmp.ne.s32.totalorder %s4107_s7, %s4103_s6 }
   0xe   : > { %p61_p6 = scmp.eq.s32.totalorder %s3904_s14, 0  ;;  %p88_p7 = scmp.eq.s32.totalorder %s3904_s14, 3 }
   0xf   : > { %s6547_s17 = smov (%p38_p4, %s6545_s17), 0  ;;  %p94_p10 = scmp.eq.s32.totalorder %s3905_s15, 3 }
  0x10   : > { %p4210_p8 = por %p61_p6, %p60_p5  ;;  %p4214_p9 = por %p88_p7, %p54_p1 }
  0x11   : > { %s40_s23 = ssub.s32 %s4127_s12, %s6547_s17  ;;  %p4220_p12 = por %p94_p10, %p60_p5 }
  0x12   : > { %s6182_s22 = scalar_select %p4214_p9, 1, 0 }
  0x13   : > { %s42_s24 = sor.u32 %s41_s19, %s40_s23  ;;  %p3932_p13 = scmp.lt.s32.totalorder %s4131_s13, 4 }
  0x14   : > { %p45_p11 = scmp.eq.s32.totalorder %s42_s24, 0  ;;  %s114_s26 = sand.u32 1, %s4111_s8  }
  0x15   : > { %s6183_s25 = scalar_select %p4220_p12, 1, 0 }
  0x16   : > { %s4227_s27 = scalar_select %p45_p11, %s4111_s8, %s47_s18  }
  0x17   : > { %s3908_s28 = sshll.u32 %s114_s26, 5  ;;  %s3909_s29 = sshll.u32 %s4123_s11, 3 }
  0x18   : > { %s3910_s30 = sshll.u32 %s4127_s12, 4  ;;  %s118_s2 = scalar_lea.vmem [#allocation2], %s3908_s28 }
  0x19   : > { %s128_s3 = sshll.u32 %s118_s2, 4  ;;  %s125_s4 = sadd.s32 %s3910_s30, %s3909_s29  ;;  %s4231_s3 = int_to_ptr.vmem [resolvable:$true] %s128_s3 }
  0x1a   : > { %s3911_s5 = sshll.u32 %s125_s4, 6  ;;  %p4235_p0 = pnand %p3932_p13, %p4202_p3 }
  0x1b   : > { %s4242_s18 = scalar_lea.hbm %s6084_s0, %s3911_s5  ;;  %s4244_s23 = scalar_lea.sflag [#allocation3], %s114_s26 }
  0x1c   : > { %s4003_s24 = scalar_lea.hbm %s4242_s18, 512  ;;  %p4005_p2 = pneg %p4235_p0 }
  0x1d   : > { %p4004_p1 = scmp.ne.s32.totalorder %s4242_s18, %s4003_s24  ;;  %s4008_s29 = scalar_lea.hbm %s6084_s0, 2048 }
  0x1e   : > { %p4009_p5 = scmp.lt.u32.totalorder %s4242_s18, %s6084_s0  ;;  %p4010_p6 = scmp.lt.u32.totalorder %s4008_s29, %s4003_s24 }
  0x1f   : > { %p4006_p3 = pnand %p4005_p2, %p4004_p1  ;;  %p4012_p10 = scmp.lt.u32.totalorder %s4003_s24, %s4242_s18 }
  0x20   : > { %p4011_p7 = por %p4010_p6, %p4009_p5 }
  0x21   : > { %p4007_p4 = pneg %p4006_p3 }
  0x22   : > { %p4013_p11 = por %p4012_p10, %p4011_p7 }
  0x24   : > { %p4014_p13 = pnand %p4013_p11, %p4007_p4 }
  0x26   : > { %4017 = shalt.err (!%p4014_p13)
}
  0x27   : > { %s4018_s26 = scalar_lea.vmem %s4231_s3, 512  ;;  %s4133_s4 = smov [#allocation2]  }
  0x28   : > { %p4019_p1 = scmp.ne.s32.totalorder %s4231_s3, %s4018_s26  ;;  %s4023_s5 = sshll.u32 %s4133_s4, 4  ;;  %s4024_s5 = int_to_ptr.vmem [resolvable:$false] %s4023_s5 }
  0x29   : > { %s4025_s15 = scalar_lea.vmem %s4024_s5, 1024  ;;  %p4026_p9 = scmp.lt.s32.totalorder %s4231_s3, %s4024_s5 }
  0x2a   : > { %p4021_p3 = pnand %p4019_p1, %p4005_p2  ;;  %p4027_p5 = scmp.lt.s32.totalorder %s4025_s15, %s4018_s26 }
  0x2c   : > { %p4022_p12 = pneg %p4021_p3  ;;  %p4028_p6 = por %p4027_p5, %p4026_p9 }
  0x2e   : > { %p4029_p7 = pnand %p4028_p6, %p4022_p12 }
  0x30   : > { %4032 = shalt.err (!%p4029_p7)
}
  0x31   : > { %s4134_s19 = smov 64   ;;  %s4135_s24 = smov 4  }
  0x32   : > { %3927 = dma.hbm_to_vmem [thread:$0]  (!%p4235_p0), %s4242_s18, 512, %s4231_s3, %s4244_s23, %s4134_s19, %s4134_s19, %s4135_s24  }
  0x33   : > { %p3912_p2 = scmp.ge.s32.totalorder %s4131_s13, 1  ;;  %p136_p4 = scmp.lt.s32.totalorder %s4131_s13, 5 }
  0x35   : > { %p137_p10 = pnand %p3912_p2, %p136_p4 }
  0x37   : > { %140 = sbr.rel (%p137_p10) target bundleno = 521 (0x209), region = 24 }
  0x3e   : > { %s4275_s20 = sand.u32 1, %s4107_s7  }
  0x3f   : > { %s3913_s28 = sshll.u32 %s4275_s20, 5  ;;  %s143_s29 = scalar_lea.sflag [#allocation3], %s4275_s20 }
  0x40   : > { %s146_s30 = scalar_lea.vmem [#allocation2], %s3913_s28 }
  0x41   : > { %4094 = dma.done.wait (%p4210_p8), %s143_s29, 512  }
  0x42   : > { %4096 = vsyncadd (%p4210_p8), %s143_s29, 4294966784  ;;  %v171_v0 = vld [vmem:[%s146_s30 + $0x14] sm:$0xf]  ;;  %v170_v1 = vld [vmem:[%s146_s30 + $0x10] sm:$0xf]  ;;  %v214_v10 = vlaneseq  ;;  %vm830_vm0 = vcmask 1040384  }
  0x43   : > { %2228 = vxpose.xlu0.b32.start.end [1/1] (short) (narrow) %v171_v0, 32  ;;  %1964 = vxpose.xlu1.b32.start.end [1/1] (short) (narrow) %v170_v1, 32  ;;  %v167_v2 = vld [vmem:[%s146_s30 + $0x4] sm:$0xf]  ;;  %v166_v3 = vld [vmem:[%s146_s30] sm:$0xf] }
  0x44   : > { %v173_v4 = vld [vmem:[%s146_s30 + $0x1c] sm:$0xf]  ;;  %v169_v5 = vld [vmem:[%s146_s30 + $0xc] sm:$0xf]  ;;  %v172_v6 = vld [vmem:[%s146_s30 + $0x18] sm:$0xf] }
  0x45   : > { %v168_v7 = vld [vmem:[%s146_s30 + $0x8] sm:$0xf]  ;;  %v4136_v8 = vmov 1966171168   ;;  %v215_v12 = vshrl.u32 %v214_v10, 7  ;;  %s3914_s21 = sshll.u32 %s4275_s20, 3 }
  0x46   : > { %v212_v9 = vunpack.c.l.s4 %v4136_v8  ;;  %v4137_v14 = vmov 1983009808   ;;  %s3916_s3 = sshll.u32 %s4119_s10, 1  ;;  %s164_s23 = scalar_lea.vmem [#allocation5], %s3914_s21 }
  0x47   : > { %v1618_v15 = vunpack.c.l.s4 %v4137_v14  ;;  %v4287_v22 = vsub.s32 0, %v215_v12  ;;  %s3809_s14 = sadd.s32 %s4115_s9, %s3916_s3  ;;  %s3813_s10 = sshll.u32 %s164_s23, 4  ;;  %s6032_s10 = int_to_ptr.vmem [resolvable:$true] %s3813_s10 }
  0x48   : > { %v213_v11 = vunpack.c.0.s8 %v212_v9  ;;  %s3917_s18 = sshll.u32 %s3809_s14, 7  ;;  %s3797_s9 = scalar_lea.sflag [#allocation4], %s4275_s20 }
  0x49   : > { %v1619_v23 = vunpack.c.0.s8 %v1618_v15  ;;  %s6030_s4 = scalar_lea.hbm %s6085_s1, %s3917_s18  ;;  %s4033_s5 = scalar_lea.vmem %s6032_s10, 128 }
  0x4a   : > { %v4283_v13 = vsub.s32 %v213_v11, %v215_v12  ;;  %p4034_p8 = scmp.ne.s32.totalorder %s6032_s10, %s4033_s5  ;;  %p6533_p9 = scmp.ne.s32.totalorder %s6182_s22, 0 }
  0x4b   : > { %v4311_v38 = vsub.s32 %v1619_v23, %v215_v12  ;;  %s4138_s15 = smov [#allocation5]  }
  0x4c   : > { %p4035_p12 = pnand %p4034_p8, %p6533_p9  ;;  %s4037_s19 = sshll.u32 %s4138_s15, 4  ;;  %s4038_s19 = int_to_ptr.vmem [resolvable:$false] %s4037_s19 }
  0x4d   : > { %s4039_s24 = scalar_lea.vmem %s4038_s19, 256  ;;  %p4040_p11 = scmp.lt.s32.totalorder %s6032_s10, %s4038_s19 }
  0x4e   : > { %p4036_p0 = pneg %p4035_p12  ;;  %p4041_p13 = scmp.lt.s32.totalorder %s4039_s24, %s4033_s5 }
  0x50   : > { %438 = vxpose.xlu0.b32.start.end [1/1] (short) (narrow) %v167_v2, 32  ;;  %174 = vxpose.xlu1.b32.start.end [1/1] (short) (narrow) %v166_v3, 32  ;;  %p4042_p1 = por %p4041_p13, %p4040_p11 }
  0x52   : > { %p4043_p3 = pnand %p4042_p1, %p4036_p0 }
  0x5d   : > { %2916 = vxpose.xlu0.b32.start.end [1/1] (short) (narrow) %v173_v4, 32  ;;  %1127 = vxpose.xlu1.b32.start.end [1/1] (short) (narrow) %v169_v5, 32 }
  0x6a   : > { %2652 = vxpose.xlu0.b32.start.end [1/1] (short) (narrow) %v172_v6, 32  ;;  %863 = vxpose.xlu1.b32.start.end [1/1] (short) (narrow) %v168_v7, 32 }
  0xc3   : > { %v2244_v16 = vpop.trf.xlu0  ;;  %v1980_v17 = vpop.trf.xlu1 }
  0xc4   : > { %v2264_v18 = vcombine.high %v2244_v16, %v2244_v16  ;;  %v2271_v19 = vrot.slane %v2244_v16, %v4283_v13  ;;  %v2000_v20 = vcombine.high %v1980_v17, %v1980_v17  ;;  %v2007_v21 = vrot.slane %v1980_v17, %v4283_v13 }
  0xc6   : > { %v2278_v24 = vrot.slane %v2264_v18, %v4283_v13  ;;  %v2279_v25 = vcombine.high %v2271_v19, %v2271_v19  ;;  %v4291_v26 = vrot.slane %v2271_v19, %v4283_v13  ;;  %v2014_v27 = vrot.slane %v2000_v20, %v4283_v13 }
  0xc7   : > { %v2015_v28 = vcombine.high %v2007_v21, %v2007_v21  ;;  %v4295_v29 = vrot.slane %v2007_v21, %v4283_v13  ;;  %v2245_v30 = vpop.trf.xlu0  ;;  %v1981_v43 = vpop.trf.xlu1 }
  0xc8   : > { %v2280_v31 = vcombine.high %v2278_v24, %v2278_v24  ;;  %v4298_v32 = vrot.slane %v2278_v24, %v4283_v13  ;;  %v4301_v33 = vrot.slane %v2279_v25, %v4283_v13  ;;  %v2309_v34 = vcombine.high %v4291_v26, %v4291_v26 }
  0xc9   : > { %v2016_v35 = vcombine.high %v2014_v27, %v2014_v27  ;;  %v4306_v36 = vrot.slane %v2014_v27, %v4283_v13  ;;  %v4309_v37 = vrot.slane %v2015_v28, %v4283_v13  ;;  %v2313_v56 = vcombine.high %v2245_v30, %v2245_v30 }
  0xca   : > { %v4314_v39 = vrot.slane %v2280_v31, %v4283_v13  ;;  %v2310_v40 = vcombine.high %v4298_v32, %v4298_v32  ;;  %v2311_v41 = vcombine.high %v4301_v33, %v4301_v33  ;;  %v4325_v45 = vrot.slane %v2309_v34, %v4287_v22 }
  0xcb   : > { %v4330_v47 = vrot.slane %v2016_v35, %v4283_v13  ;;  %v2246_v52 = vpop.trf.xlu0  ;;  %v2320_v58 = vrot.slane %v2245_v30, %v4283_v13  ;;  %v2049_v59 = vcombine.high %v1981_v43, %v1981_v43  ;;  %v2056_v60 = vrot.slane %v1981_v43, %v4283_v13  ;;  %v1982_v5 = vpop.trf.xlu1 }
  0xcc   : > { %v2312_v48 = vcombine.high %v4314_v39, %v4314_v39  ;;  %v4335_v49 = vrot.slane %v2311_v41, %v4287_v22  ;;  %v4342_v53 = vrot.slane %v2310_v40, %v4287_v22  ;;  %v2327_v62 = vrot.slane %v2313_v56, %v4283_v13 }
  0xcd   : > { %v2362_v63 = vcombine.high %v2246_v52, %v2246_v52  ;;  %v2369_v0 = vrot.slane %v2246_v52, %v4283_v13  ;;  %v2328_v1 = vcombine.high %v2320_v58, %v2320_v58  ;;  %v2336_v2 = vrot.slane %v2320_v58, %v4283_v13 }
  0xce   : > { %v4353_v61 = vrot.slane %v2312_v48, %v4287_v22  ;;  %v2063_v3 = vrot.slane %v2049_v59, %v4283_v13  ;;  %v2064_v4 = vcombine.high %v2056_v60, %v2056_v60  ;;  %v2329_v6 = vcombine.high %v2327_v62, %v2327_v62 }
  0xcf   : > { %v4360_v7 = vrot.slane %v2327_v62, %v4283_v13  ;;  %v4363_v8 = vrot.slane %v2056_v60, %v4283_v13  ;;  %v2098_v9 = vcombine.high %v1982_v5, %v1982_v5  ;;  %v4366_v10 = vrot.slane %v2328_v1, %v4283_v13  ;;  %v2247_v40 = vpop.trf.xlu0 }
  0xd0   : > { %v2358_v11 = vcombine.high %v2336_v2, %v2336_v2  ;;  %v2065_v12 = vcombine.high %v2063_v3, %v2063_v3  ;;  %v2376_v14 = vrot.slane %v2362_v63, %v4283_v13  ;;  %v4370_v15 = vrot.slane %v2329_v6, %v4283_v13 }
  0xd1   : > { %v2359_v16 = vcombine.high %v4360_v7, %v4360_v7  ;;  %v2495_v17 = vrot.slane %v2336_v2, %v4287_v22  ;;  %v4376_v18 = vrot.slane %v2063_v3, %v4283_v13  ;;  %v2360_v19 = vcombine.high %v4366_v10, %v4366_v10 }
  0xd2   : > { %6185 = vst [vmem:[#allocation8_spill] sm:$0xff] %v4370_v15  ;;  %v4385_v23 = vrot.slane %v2064_v4, %v4283_v13  ;;  %v2361_v24 = vcombine.high %v4370_v15, %v4370_v15  ;;  %v4390_v25 = vrot.slane %v2358_v11, %v4287_v22  ;;  %v4395_v28 = vrot.slane %v2065_v12, %v4283_v13 }
  0xd3   : > { %v4398_v30 = vrot.slane %v2360_v19, %v4287_v22  ;;  %v4401_v31 = vrot.slane %v2359_v16, %v4287_v22  ;;  %v4414_v48 = vsel %vm830_vm0, %v4363_v8, %v2495_v17  ;;  %v2377_v52 = vcombine.high %v2369_v0, %v2369_v0  ;;  %v454_v43 = vpop.trf.xlu0 }
  0xd4   : > { %6186 = vst [vmem:[#allocation9_spill] sm:$0xff] %v4395_v28  ;;  %v4408_v41 = vrot.slane %v2361_v24, %v4287_v22  ;;  %v2378_v56 = vcombine.high %v2376_v14, %v2376_v14  ;;  %v2385_v58 = vrot.slane %v2369_v0, %v4283_v13  ;;  %v4418_v59 = vrot.slane %v2376_v14, %v4283_v13 }
  0xd5   : > { %6187 = vst [vmem:[#allocation10_spill] sm:$0xff] %v4401_v31  ;;  %v2105_v60 = vrot.slane %v1982_v5, %v4283_v13  ;;  %v4424_v63 = vrot.slane %v2377_v52, %v4283_v13  ;;  %v2112_v1 = vrot.slane %v2098_v9, %v4283_v13  ;;  %v2411_v2 = vcombine.high %v2247_v40, %v2247_v40 }
  0xd6   : > { %6188 = vst [vmem:[#allocation11_spill] sm:$0xff] %v4408_v41  ;;  %6189 = vst [vmem:[#allocation12_spill] sm:$0xff] %v4418_v59  ;;  %v4428_v3 = vrot.slane %v2378_v56, %v4283_v13  ;;  %v2407_v4 = vcombine.high %v2385_v58, %v2385_v58  ;;  %v2408_v0 = vcombine.high %v4418_v59, %v4418_v59 }
  0xd7   : > { %6190 = vst [vmem:[#allocation13_spill] sm:$0xff] %v4424_v63  ;;  %v2418_v6 = vrot.slane %v2247_v40, %v4283_v13  ;;  %v2409_v5 = vcombine.high %v4424_v63, %v4424_v63  ;;  %v2527_v11 = vrot.slane %v2385_v58, %v4287_v22  ;;  %v2113_v14 = vcombine.high %v2105_v60, %v2105_v60 }
  0xd8   : > { %6191 = vst [vmem:[#allocation14_spill] sm:$0xff] %v4428_v3  ;;  %v2410_v9 = vcombine.high %v4428_v3, %v4428_v3  ;;  %v4441_v16 = vrot.slane %v2407_v4, %v4287_v22  ;;  %v4448_v24 = vrot.slane %v2408_v0, %v4287_v22  ;;  %v2114_v40 = vcombine.high %v2112_v1, %v2112_v1 }
  0xd9   : > { %v4451_v52 = vrot.slane %v2105_v60, %v4283_v13  ;;  %v4454_v56 = vrot.slane %v2112_v1, %v4283_v13  ;;  %v4457_v58 = vrot.slane %v2409_v5, %v4287_v22  ;;  %v4460_v4 = vrot.slane %v2113_v14, %v4283_v13 }
  0xda   : > { %6192 = vst [vmem:[#allocation15_spill] sm:$0xff] %v4441_v16  ;;  %6193 = vst [vmem:[#allocation16_spill] sm:$0xff] %v4448_v24  ;;  %v2425_v17 = vrot.slane %v2411_v2, %v4283_v13  ;;  %v2426_v12 = vcombine.high %v2418_v6, %v2418_v6  ;;  %v4464_v19 = vrot.slane %v2410_v9, %v4287_v22  ;;  %v1983_v9 = vpop.trf.xlu1 }
  0xdb   : > { %6194 = vst [vmem:[#allocation17_spill] sm:$0xff] %v4451_v52  ;;  %6195 = vst [vmem:[#allocation18_spill] sm:$0xff] %v4454_v56  ;;  %v4467_v0 = vrot.slane %v2114_v40, %v4283_v13  ;;  %v4473_v1 = vsel %vm830_vm0, %v4451_v52, %v2527_v11  ;;  %v2434_v2 = vrot.slane %v2418_v6, %v4283_v13 }
  0xdc   : > { %6196 = vst [vmem:[#allocation19_spill] sm:$0xff] %v4457_v58  ;;  %6197 = vst [vmem:[#allocation20_spill] sm:$0xff] %v4460_v4  ;;  %v2427_v14 = vcombine.high %v2425_v17, %v2425_v17  ;;  %v4479_v62 = vrot.slane %v2425_v17, %v4283_v13  ;;  %v4484_v35 = vrot.slane %v2426_v12, %v4283_v13 }
  0xdd   : > { %6198 = vst [vmem:[#allocation21_spill] sm:$0xff] %v4464_v19  ;;  %6199 = vst [vmem:[#allocation22_spill] sm:$0xff] %v4467_v0  ;;  %v2147_v60 = vcombine.high %v1983_v9, %v1983_v9  ;;  %v2154_v11 = vrot.slane %v1983_v9, %v4283_v13  ;;  %v2456_v6 = vcombine.high %v2434_v2, %v2434_v2 }
  0xde   : > { %6200 = vst [vmem:[#allocation23_spill] sm:$0xff] %v4473_v1  ;;  %6201 = vst [vmem:[#allocation24_spill] sm:$0xff] %v4479_v62  ;;  %v4490_v5 = vrot.slane %v2427_v14, %v4283_v13  ;;  %v2457_v17 = vcombine.high %v4479_v62, %v4479_v62  ;;  %v2458_v21 = vcombine.high %v4484_v35, %v4484_v35 }
  0xdf   : > { %6202 = vst [vmem:[#allocation25_spill] sm:$0xff] %v4484_v35  ;;  %v2559_v40 = vrot.slane %v2434_v2, %v4287_v22  ;;  %v2161_v9 = vrot.slane %v2147_v60, %v4283_v13  ;;  %v4503_v14 = vrot.slane %v2456_v6, %v4287_v22  ;;  %v2162_v57 = vcombine.high %v2154_v11, %v2154_v11 }
  0xe0   : > { %6203 = vst [vmem:[#allocation26_spill] sm:$0xff] %v4490_v5  ;;  %v2459_v27 = vcombine.high %v4490_v5, %v4490_v5  ;;  %v4510_v2 = vrot.slane %v2457_v17, %v4287_v22  ;;  %v4513_v60 = vrot.slane %v2154_v11, %v4283_v13  ;;  %v4516_v54 = vrot.slane %v2458_v21, %v4287_v22 }
  0xe1   : > { %6204 = vst [vmem:[#allocation27_spill] sm:$0xff] %v4503_v14  ;;  %v2163_v12 = vcombine.high %v2161_v9, %v2161_v9  ;;  %v4519_v6 = vrot.slane %v2161_v9, %v4283_v13  ;;  %v474_v50 = vcombine.high %v454_v43, %v454_v43  ;;  %v481_v34 = vrot.slane %v454_v43, %v4283_v13 }
  0xe2   : > { %6205 = vst [vmem:[#allocation28_spill] sm:$0xff] %v4510_v2  ;;  %6206 = vst [vmem:[#allocation29_spill] sm:$0xff] %v4513_v60  ;;  %v4523_v46 = vrot.slane %v2459_v27, %v4287_v22  ;;  %v4526_v17 = vrot.slane %v2162_v57, %v4283_v13  ;;  %v4533_v11 = vsel %vm830_vm0, %v4513_v60, %v2559_v40  ;;  %v190_v27 = vpop.trf.xlu1 }
  0xe3   : > { %6207 = vst [vmem:[#allocation30_spill] sm:$0xff] %v4516_v54  ;;  %6208 = vst [vmem:[#allocation31_spill] sm:$0xff] %v4519_v6  ;;  %v4529_v20 = vrot.slane %v2163_v12, %v4283_v13  ;;  %v488_v9 = vrot.slane %v474_v50, %v4283_v13  ;;  %v489_v55 = vcombine.high %v481_v34, %v481_v34 }
  0xe4   : > { %6209 = vst [vmem:[#allocation32_spill] sm:$0xff] %v4523_v46  ;;  %6210 = vst [vmem:[#allocation33_spill] sm:$0xff] %v4526_v17  ;;  %v4539_v43 = vrot.slane %v481_v34, %v4283_v13  ;;  %v210_v51 = vcombine.high %v190_v27, %v190_v27  ;;  %v217_v40 = vrot.slane %v190_v27, %v4283_v13 }
  0xe5   : > { %6211 = vst [vmem:[#allocation34_spill] sm:$0xff] %v4529_v20  ;;  %6212 = vst [vmem:[#allocation35_spill] sm:$0xff] %v4533_v11  ;;  %v490_v44 = vcombine.high %v488_v9, %v488_v9  ;;  %v4547_v42 = vrot.slane %v488_v9, %v4283_v13  ;;  %v4550_v50 = vrot.slane %v489_v55, %v4283_v13 }
  0xe6   : > { %v519_v34 = vcombine.high %v4539_v43, %v4539_v43  ;;  %v224_v57 = vrot.slane %v210_v51, %v4283_v13  ;;  %v225_v46 = vcombine.high %v217_v40, %v217_v40  ;;  %v4558_v12 = vrot.slane %v217_v40, %v4283_v13 }
  0xe7   : > { %v4561_v27 = vrot.slane %v490_v44, %v4283_v13  ;;  %v520_v9 = vcombine.high %v4547_v42, %v4547_v42  ;;  %v521_v55 = vcombine.high %v4550_v50, %v4550_v50 }
  0xe8   : > { %v4572_v51 = vrot.slane %v519_v34, %v4287_v22  ;;  %v226_v40 = vcombine.high %v224_v57, %v224_v57  ;;  %v4575_v20 = vrot.slane %v224_v57, %v4283_v13  ;;  %v4590_v34 = vrot.slane %v225_v46, %v4283_v13 }
  0xe9   : > { %v522_v44 = vcombine.high %v4561_v27, %v4561_v27  ;;  %v4580_v5 = vrot.slane %v521_v55, %v4287_v22  ;;  %v4587_v21 = vrot.slane %v520_v9, %v4287_v22  ;;  %v455_v55 = vpop.trf.xlu0  ;;  %v6213_v9 = vrot.slane %v4291_v26, %v4287_v22 }
  0xea   : > { %v4593_v57 = vrot.slane %v226_v40, %v4283_v13  ;;  %v6214_v40 = vrot.slane %v4301_v33, %v4287_v22  ;;  %v6216_v26 = vcombine.high %v4309_v37, %v4309_v37  ;;  %v191_v33 = vpop.trf.xlu1  ;;  %v523_v14 = vcombine.high %v455_v55, %v455_v55 }
  0xeb   : > { %v4598_v11 = vrot.slane %v522_v44, %v4287_v22  ;;  %v2620_v46 = vsel %vm830_vm0, %v4295_v29, %v6213_v9  ;;  %v6215_v44 = vcombine.high %v4295_v29, %v4295_v29  ;;  %v259_v17 = vcombine.high %v191_v33, %v191_v33 }
  0xec   : > { %v2621_v2 = vsel %vm830_vm0, %v4309_v37, %v6214_v40  ;;  %v2623_v9 = vsel %vm830_vm0, %v6216_v26, %v4335_v49  ;;  %v530_v40 = vrot.slane %v455_v55, %v4283_v13 }
  0xed   : > { %v2622_v6 = vsel %vm830_vm0, %v6215_v44, %v4325_v45  ;;  %v3404_v54 = vcombine.low %v2620_v46, %v2621_v2  ;;  %v266_v45 = vrot.slane %v191_v33, %v4283_v13  ;;  %v6217_v44 = vrot.slane %v4298_v32, %v4287_v22  ;;  %v456_v33 = vpop.trf.xlu0 }
  0xee   : > { %v3405_v60 = vcombine.low %v2622_v6, %v2623_v9  ;;  %v537_v2 = vrot.slane %v523_v14, %v4283_v13  ;;  %v538_v6 = vcombine.high %v530_v40, %v530_v40  ;;  %v546_v55 = vrot.slane %v530_v40, %v4283_v13  ;;  %v192_v24 = vpop.trf.xlu1 }
  0xef   : > { %v3412_v29 = vrot.slane %v3404_v54, %v4311_v38  ;;  %v2624_v37 = vsel %vm830_vm0, %v4306_v36, %v6217_v44  ;;  %v273_v46 = vrot.slane %v259_v17, %v4283_v13  ;;  %v274_v26 = vcombine.high %v266_v45, %v266_v45 }
  0xf0   : > { %v3419_v49 = vrot.slane %v3405_v60, %v4311_v38  ;;  %v4639_v54 = vrot.slane %v266_v45, %v4283_v13  ;;  %v6218_v9 = vrot.slane %v4314_v39, %v4287_v22  ;;  %v539_v60 = vcombine.high %v537_v2, %v537_v2 }
  0xf1   : > { %v4647_v14 = vrot.slane %v537_v2, %v4283_v13  ;;  %v4650_v40 = vrot.slane %v538_v6, %v4283_v13  ;;  %v568_v17 = vcombine.high %v546_v55, %v546_v55  ;;  %v275_v62 = vcombine.high %v273_v46, %v273_v46 }
  0xf2   : > { %v2625_v32 = vsel %vm830_vm0, %v4330_v47, %v6218_v9  ;;  %v3420_v44 = vcombine.low %v3412_v29, %v3419_v49  ;;  %v4653_v45 = vrot.slane %v273_v46, %v4283_v13  ;;  %v6221_v39 = vcombine.high %v4306_v36, %v4306_v36 }
  0xf3   : > { %6219 = vst [vmem:[#allocation36_spill] sm:$0xff] %v4647_v14  ;;  %v4661_v29 = vrot.slane %v539_v60, %v4283_v13  ;;  %v569_v49 = vcombine.high %v4647_v14, %v4647_v14  ;;  %v570_v2 = vcombine.high %v4650_v40, %v4650_v40  ;;  %v705_v6 = vrot.slane %v546_v55, %v4287_v22 }
  0xf4   : > { %6220 = vst [vmem:[#allocation37_spill] sm:$0xff] %v4653_v45  ;;  %v2626_v9 = vsel %vm830_vm0, %v6221_v39, %v4342_v53  ;;  %3692 = vxpose.xlu1.b32.start [1/16] (narrow) %v3420_v44, 8  ;;  %v4671_v35 = vrot.slane %v568_v17, %v4287_v22  ;;  %v4674_v36 = vrot.slane %v274_v26, %v4283_v13 }
  0xf5   : > { %6222 = vst [vmem:[#allocation38_spill] sm:$0xff] %v4661_v29  ;;  %v4677_v53 = vrot.slane %v275_v62, %v4283_v13  ;;  %v571_v44 = vcombine.high %v4661_v29, %v4661_v29  ;;  %v4682_v60 = vrot.slane %v570_v2, %v4287_v22  ;;  %v4689_v17 = vrot.slane %v569_v49, %v4287_v22  ;;  %v457_v2 = vpop.trf.xlu0 }
  0xf6   : > { %v6226_v49 = vcombine.high %v4330_v47, %v4330_v47  ;;  %v3421_v26 = vcombine.low %v2624_v37, %v2625_v32  ;;  %v572_v62 = vcombine.high %v456_v33, %v456_v33  ;;  %v579_v3 = vrot.slane %v456_v33, %v4283_v13 }
  0xf7   : > { %6223 = vst [vmem:[#allocation39_spill] sm:$0xff] %v4677_v53  ;;  %6224 = vst [vmem:[#allocation40_spill] sm:$0xff] %v4689_v17  ;;  %v4698_v19 = vrot.slane %v571_v44, %v4287_v22  ;;  %v308_v46 = vcombine.high %v192_v24, %v192_v24  ;;  %v4710_v44 = vsel %vm830_vm0, %v4639_v54, %v705_v6 }
  0xf8   : > { %v2627_v39 = vsel %vm830_vm0, %v6226_v49, %v4353_v61  ;;  %v3429_v56 = vrot.slane %v3421_v26, %v4311_v38  ;;  %v315_v55 = vrot.slane %v192_v24, %v4283_v13  ;;  %v621_v59 = vcombine.high %v457_v2, %v457_v2 }
  0xf9   : > { %6225 = vst [vmem:[#allocation41_spill] sm:$0xff] %v4698_v19  ;;  %v3422_v0 = vcombine.low %v2626_v9, %v2627_v39  ;;  %v586_v61 = vrot.slane %v572_v62, %v4283_v13  ;;  %v587_v37 = vcombine.high %v579_v3, %v579_v3  ;;  %v595_v32 = vrot.slane %v579_v3, %v4283_v13 }
  0xfa   : > { %v322_v9 = vrot.slane %v308_v46, %v4283_v13  ;;  %v323_v33 = vcombine.high %v315_v55, %v315_v55  ;;  %v4719_v39 = vrot.slane %v315_v55, %v4283_v13  ;;  %v628_v6 = vrot.slane %v457_v2, %v4283_v13 }
  0xfb   : > { %v3436_v47 = vrot.slane %v3422_v0, %v4311_v38  ;;  %v588_v26 = vcombine.high %v586_v61, %v586_v61  ;;  %v4723_v24 = vrot.slane %v586_v61, %v4283_v13  ;;  %v4726_v0 = vrot.slane %v587_v37, %v4283_v13 }
  0xfc   : > { %6227 = vst [vmem:[#allocation42_spill] sm:$0xff] %v4719_v39  ;;  %v617_v62 = vcombine.high %v595_v32, %v595_v32  ;;  %v324_v1 = vcombine.high %v322_v9, %v322_v9  ;;  %v4729_v3 = vrot.slane %v322_v9, %v4283_v13  ;;  %v635_v46 = vrot.slane %v621_v59, %v4283_v13 }
  0xfd   : > { %v3437_v49 = vcombine.low %v3429_v56, %v3436_v47  ;;  %6228 = vst [vmem:[#allocation43_spill] sm:$0xff] %v4723_v24  ;;  %6229 = vst [vmem:[#allocation44_spill] sm:$0xff] %v4726_v0  ;;  %v4733_v55 = vrot.slane %v588_v26, %v4283_v13  ;;  %v618_v56 = vcombine.high %v4723_v24, %v4723_v24 }
  0xfe   : > { %6230 = vst [vmem:[#allocation45_spill] sm:$0xff] %v4729_v3  ;;  %v619_v2 = vcombine.high %v4726_v0, %v4726_v0  ;;  %v737_v47 = vrot.slane %v595_v32, %v4287_v22  ;;  %v4743_v37 = vrot.slane %v617_v62, %v4287_v22  ;;  %v4746_v59 = vrot.slane %v323_v33, %v4283_v13 }
  0xff   : > { %3693 = vxpose.xlu1.b32.cont [2/16] (narrow) %v3437_v49, 8  ;;  %6231 = vst [vmem:[#allocation46_spill] sm:$0xff] %v4733_v55  ;;  %v4749_v9 = vrot.slane %v324_v1, %v4283_v13  ;;  %v620_v49 = vcombine.high %v4733_v55, %v4733_v55  ;;  %v4761_v62 = vrot.slane %v618_v56, %v4287_v22  ;;  %v193_v56 = vpop.trf.xlu1 }
 0x100   : > { %6232 = vst [vmem:[#allocation47_spill] sm:$0xff] %v4743_v37  ;;  %6233 = vst [vmem:[#allocation48_spill] sm:$0xff] %v4746_v59  ;;  %v4754_v26 = vrot.slane %v619_v2, %v4287_v22  ;;  %v2932_v2 = vpop.trf.xlu0  ;;  %v636_v61 = vcombine.high %v628_v6, %v628_v6  ;;  %v637_v55 = vcombine.high %v635_v46, %v635_v46 }
 0x101   : > { %6234 = vst [vmem:[#allocation49_spill] sm:$0xff] %v4749_v9  ;;  %6236 = vst [vmem:[#allocation51_spill] sm:$0xff] %v4761_v62  ;;  %v644_v62 = vrot.slane %v628_v6, %v4283_v13  ;;  %v4776_v33 = vrot.slane %v635_v46, %v4283_v13  ;;  %v357_v24 = vcombine.high %v193_v56, %v193_v56 }
 0x102   : > { %6235 = vst [vmem:[#allocation50_spill] sm:$0xff] %v4754_v26  ;;  %v4770_v26 = vrot.slane %v620_v49, %v4287_v22  ;;  %v364_v1 = vrot.slane %v193_v56, %v4283_v13  ;;  %v4781_v37 = vsel %vm830_vm0, %v4719_v39, %v737_v47  ;;  %v4784_v49 = vrot.slane %v636_v61, %v4283_v13 }
 0x103   : > { %6238 = vst [vmem:[#allocation53_spill] sm:$0xff] %v4776_v33  ;;  %6239 = vst [vmem:[#allocation54_spill] sm:$0xff] %v4781_v37  ;;  %v4787_v32 = vrot.slane %v637_v55, %v4283_v13  ;;  %v666_v9 = vcombine.high %v644_v62, %v644_v62  ;;  %v667_v6 = vcombine.high %v4776_v33, %v4776_v33 }
 0x104   : > { %6237 = vst [vmem:[#allocation52_spill] sm:$0xff] %v4770_v26  ;;  %6240 = vst [vmem:[#allocation55_spill] sm:$0xff] %v4784_v49  ;;  %v2952_v26 = vcombine.high %v2932_v2, %v2932_v2  ;;  %v769_v46 = vrot.slane %v644_v62, %v4287_v22  ;;  %v2959_v3 = vrot.slane %v2932_v2, %v4283_v13 }
 0x105   : > { %6241 = vst [vmem:[#allocation56_spill] sm:$0xff] %v4787_v32  ;;  %v668_v56 = vcombine.high %v4784_v49, %v4784_v49  ;;  %v669_v47 = vcombine.high %v4787_v32, %v4787_v32  ;;  %v4802_v37 = vrot.slane %v666_v9, %v4287_v22  ;;  %v371_v2 = vrot.slane %v357_v24, %v4283_v13 }
 0x106   : > { %v372_v39 = vcombine.high %v364_v1, %v364_v1  ;;  %v4811_v0 = vrot.slane %v667_v6, %v4287_v22  ;;  %v4814_v61 = vrot.slane %v364_v1, %v4283_v13  ;;  %v2966_v55 = vrot.slane %v2952_v26, %v4283_v13 }
 0x107   : > { %6242 = vst [vmem:[#allocation57_spill] sm:$0xff] %v4802_v37  ;;  %v4808_v59 = vrot.slane %v668_v56, %v4287_v22  ;;  %v373_v33 = vcombine.high %v371_v2, %v371_v2  ;;  %v4818_v9 = vrot.slane %v371_v2, %v4283_v13  ;;  %v2967_v24 = vcombine.high %v2959_v3, %v2959_v3  ;;  %v1143_v2 = vpop.trf.xlu1 }
 0x108   : > { %6244 = vst [vmem:[#allocation59_spill] sm:$0xff] %v4811_v0  ;;  %6245 = vst [vmem:[#allocation60_spill] sm:$0xff] %v4814_v61  ;;  %v4821_v62 = vrot.slane %v372_v39, %v4283_v13  ;;  %v4824_v32 = vrot.slane %v669_v47, %v4287_v22  ;;  %v2968_v56 = vcombine.high %v2966_v55, %v2966_v55 }
 0x109   : > { %6243 = vst [vmem:[#allocation58_spill] sm:$0xff] %v4808_v59  ;;  %6246 = vst [vmem:[#allocation61_spill] sm:$0xff] %v4818_v9  ;;  %v4829_v1 = vrot.slane %v2959_v3, %v4283_v13  ;;  %v4832_v26 = vrot.slane %v373_v33, %v4283_v13  ;;  %v4838_v39 = vsel %vm830_vm0, %v4814_v61, %v769_v46  ;;  %v2933_v61 = vpop.trf.xlu0 }
 0x10a   : > { %6247 = vst [vmem:[#allocation62_spill] sm:$0xff] %v4821_v62  ;;  %6248 = vst [vmem:[#allocation63_spill] sm:$0xff] %v4824_v32  ;;  %v4841_v47 = vrot.slane %v2966_v55, %v4283_v13  ;;  %v4846_v32 = vrot.slane %v2967_v24, %v4283_v13  ;;  %v4849_v3 = vrot.slane %v2968_v56, %v4283_v13 }
 0x10b   : > { %6249 = vst [vmem:[#allocation64_spill] sm:$0xff] %v4832_v26  ;;  %6250 = vst [vmem:[#allocation65_spill] sm:$0xff] %v4838_v39  ;;  %v2997_v33 = vcombine.high %v4829_v1, %v4829_v1  ;;  %v1163_v6 = vcombine.high %v1143_v2, %v1143_v2  ;;  %v1170_v0 = vrot.slane %v1143_v2, %v4283_v13 }
 0x10c   : > { %v2998_v55 = vcombine.high %v4841_v47, %v4841_v47  ;;  %v2999_v24 = vcombine.high %v4846_v32, %v4846_v32  ;;  %v3000_v56 = vcombine.high %v4849_v3, %v4849_v3  ;;  %v6251_v39 = vrot.slane %v4539_v43, %v4287_v22 }
 0x10d   : > { %v4868_v46 = vrot.slane %v2997_v33, %v4287_v22  ;;  %v1177_v59 = vrot.slane %v1163_v6, %v4283_v13  ;;  %v6252_v26 = vrot.slane %v4550_v50, %v4287_v22  ;;  %v1178_v6 = vcombine.high %v1170_v0, %v1170_v0 }
 0x10e   : > { %v4875_v37 = vrot.slane %v2999_v24, %v4287_v22  ;;  %v4878_v62 = vrot.slane %v2998_v55, %v4287_v22  ;;  %v831_v33 = vsel %vm830_vm0, %v4558_v12, %v6251_v39  ;;  %v4891_v24 = vrot.slane %v1170_v0, %v4283_v13 }
 0x10f   : > { %v832_v2 = vsel %vm830_vm0, %v4590_v34, %v6252_v26  ;;  %v1179_v9 = vcombine.high %v1177_v59, %v1177_v59  ;;  %v4894_v55 = vrot.slane %v1177_v59, %v4283_v13  ;;  %v6253_v43 = vcombine.high %v4558_v12, %v4558_v12 }
 0x110   : > { %v6254_v50 = vcombine.high %v4590_v34, %v4590_v34  ;;  %v1615_v49 = vcombine.low %v831_v33, %v832_v2  ;;  %v3001_v58 = vcombine.high %v2933_v61, %v2933_v61  ;;  %v4907_v0 = vrot.slane %v1178_v6, %v4283_v13 }
 0x111   : > { %v833_v39 = vsel %vm830_vm0, %v6253_v43, %v4572_v51  ;;  %v4910_v59 = vrot.slane %v1179_v9, %v4283_v13  ;;  %v1208_v52 = vcombine.high %v4891_v24, %v4891_v24  ;;  %v1209_v12 = vcombine.high %v4894_v55, %v4894_v55 }
 0x112   : > { %v834_v26 = vsel %vm830_vm0, %v6254_v50, %v4580_v5  ;;  %v4917_v51 = vrot.slane %v3000_v56, %v4287_v22  ;;  %v1210_v9 = vcombine.high %v4907_v0, %v4907_v0  ;;  %v1623_v43 = vrot.slane %v1615_v49, %v4311_v38 }
 0x113   : > { %v1616_v33 = vcombine.low %v833_v39, %v834_v26  ;;  %v1211_v2 = vcombine.high %v4910_v59, %v4910_v59  ;;  %v4931_v56 = vrot.slane %v1208_v52, %v4287_v22  ;;  %v3008_v39 = vrot.slane %v2933_v61, %v4283_v13  ;;  %v1144_v26 = vpop.trf.xlu1 }
 0x114   : > { %v4938_v5 = vrot.slane %v1210_v9, %v4287_v22  ;;  %v4941_v16 = vrot.slane %v1209_v12, %v4287_v22  ;;  %v3015_v6 = vrot.slane %v3001_v58, %v4283_v13  ;;  %v1212_v49 = vcombine.high %v1144_v26, %v1144_v26 }
 0x115   : > { %v1630_v34 = vrot.slane %v1616_v33, %v4311_v38  ;;  %v3016_v52 = vcombine.high %v3008_v39, %v3008_v39  ;;  %v4945_v63 = vrot.slane %v3008_v39, %v4283_v13  ;;  %v1219_v50 = vrot.slane %v1144_v26, %v4283_v13 }
 0x116   : > { %v4949_v33 = vrot.slane %v1211_v2, %v4287_v22  ;;  %v3017_v61 = vcombine.high %v3015_v6, %v3015_v6  ;;  %v4952_v9 = vrot.slane %v3015_v6, %v4283_v13  ;;  %v1226_v12 = vrot.slane %v1212_v49, %v4283_v13 }
 0x117   : > { %v1631_v4 = vcombine.low %v1623_v43, %v1630_v34  ;;  %v4956_v58 = vrot.slane %v3016_v52, %v4283_v13  ;;  %v3046_v34 = vcombine.high %v4945_v63, %v4945_v63  ;;  %v1227_v43 = vcombine.high %v1219_v50, %v1219_v50  ;;  %v2934_v52 = vpop.trf.xlu0 }
 0x118   : > { %6255 = vst [vmem:[#allocation66_spill] sm:$0xff] %v4952_v9  ;;  %v6257_v39 = vrot.slane %v4547_v42, %v4287_v22  ;;  %v4966_v26 = vrot.slane %v3017_v61, %v4283_v13  ;;  %v3047_v6 = vcombine.high %v4952_v9, %v4952_v9  ;;  %v1228_v49 = vcombine.high %v1226_v12, %v1226_v12 }
 0x119   : > { %1903 = vxpose.xlu0.b32.start [1/16] (narrow) %v1631_v4, 8  ;;  %6256 = vst [vmem:[#allocation67_spill] sm:$0xff] %v4956_v58  ;;  %v3048_v19 = vcombine.high %v4956_v58, %v4956_v58  ;;  %v4979_v61 = vrot.slane %v1219_v50, %v4283_v13  ;;  %v4984_v53 = vrot.slane %v3046_v34, %v4287_v22 }
 0x11a   : > { %v835_v2 = vsel %vm830_vm0, %v4575_v20, %v6257_v39  ;;  %6258 = vst [vmem:[#allocation68_spill] sm:$0xff] %v4966_v26  ;;  %v3049_v17 = vcombine.high %v4966_v26, %v4966_v26  ;;  %v4989_v29 = vrot.slane %v1226_v12, %v4283_v13  ;;  %v4992_v42 = vrot.slane %v3047_v6, %v4287_v22 }
 0x11b   : > { %6259 = vst [vmem:[#allocation69_spill] sm:$0xff] %v4984_v53  ;;  %v4995_v39 = vrot.slane %v1227_v43, %v4283_v13  ;;  %v4998_v50 = vrot.slane %v1228_v49, %v4283_v13  ;;  %v1257_v9 = vcombine.high %v4979_v61, %v4979_v61  ;;  %v5003_v34 = vrot.slane %v3048_v19, %v4287_v22  ;;  %v2935_v53 = vpop.trf.xlu0 }
 0x11c   : > { %6260 = vst [vmem:[#allocation70_spill] sm:$0xff] %v4989_v29  ;;  %6261 = vst [vmem:[#allocation71_spill] sm:$0xff] %v4992_v42  ;;  %v5006_v4 = vrot.slane %v3049_v17, %v4287_v22  ;;  %v1258_v12 = vcombine.high %v4989_v29, %v4989_v29  ;;  %v6268_v26 = vrot.slane %v4561_v27, %v4287_v22 }
 0x11d   : > { %6262 = vst [vmem:[#allocation72_spill] sm:$0xff] %v4995_v39  ;;  %6263 = vst [vmem:[#allocation73_spill] sm:$0xff] %v4998_v50  ;;  %v1259_v43 = vcombine.high %v4995_v39, %v4995_v39  ;;  %v1260_v49 = vcombine.high %v4998_v50, %v4998_v50  ;;  %v5021_v17 = vrot.slane %v1257_v9, %v4287_v22 }
 0x11e   : > { %6264 = vst [vmem:[#allocation74_spill] sm:$0xff] %v5003_v34  ;;  %6265 = vst [vmem:[#allocation75_spill] sm:$0xff] %v5006_v4  ;;  %v5026_v6 = vrot.slane %v1258_v12, %v4287_v22  ;;  %v836_v34 = vsel %vm830_vm0, %v4593_v57, %v6268_v26  ;;  %v6270_v9 = vcombine.high %v4575_v20, %v4575_v20 }
 0x11f   : > { %6266 = vst [vmem:[#allocation76_spill] sm:$0xff] %v5021_v17  ;;  %v5034_v42 = vrot.slane %v1259_v43, %v4287_v22  ;;  %v6271_v12 = vcombine.high %v4593_v57, %v4593_v57  ;;  %v1632_v27 = vcombine.low %v835_v2, %v836_v34  ;;  %v3050_v26 = vcombine.high %v2934_v52, %v2934_v52 }
 0x120   : > { %6267 = vst [vmem:[#allocation77_spill] sm:$0xff] %v5026_v6  ;;  %v837_v19 = vsel %vm830_vm0, %v6270_v9, %v4587_v21  ;;  %v1145_v6 = vpop.trf.xlu1  ;;  %v3057_v29 = vrot.slane %v2934_v52, %v4283_v13  ;;  %v3099_v9 = vcombine.high %v2935_v53, %v2935_v53 }
 0x121   : > { %6269 = vst [vmem:[#allocation78_spill] sm:$0xff] %v5034_v42  ;;  %v838_v4 = vsel %vm830_vm0, %v6271_v12, %v4598_v11  ;;  %v1261_v43 = vcombine.high %v1145_v6, %v1145_v6  ;;  %v5048_v42 = vrot.slane %v1260_v49, %v4287_v22  ;;  %v1640_v20 = vrot.slane %v1632_v27, %v4311_v38 }
 0x122   : > { %v1633_v50 = vcombine.low %v837_v19, %v838_v4  ;;  %v1268_v21 = vrot.slane %v1145_v6, %v4283_v13  ;;  %v3064_v57 = vrot.slane %v3050_v26, %v4283_v13  ;;  %v3065_v11 = vcombine.high %v3057_v29, %v3057_v29 }
 0x123   : > { %6272 = vst [vmem:[#allocation79_spill] sm:$0xff] %v5048_v42  ;;  %v5055_v2 = vrot.slane %v3057_v29, %v4283_v13  ;;  %v1275_v4 = vrot.slane %v1261_v43, %v4283_v13  ;;  %v3106_v49 = vrot.slane %v2935_v53, %v4283_v13  ;;  %v3113_v43 = vrot.slane %v3099_v9, %v4283_v13 }
 0x124   : > { %v1647_v17 = vrot.slane %v1633_v50, %v4311_v38  ;;  %v1276_v52 = vcombine.high %v1268_v21, %v1268_v21  ;;  %v5059_v34 = vrot.slane %v1268_v21, %v4283_v13  ;;  %v3066_v12 = vcombine.high %v3064_v57, %v3064_v57 }
 0x125   : > { %v5063_v6 = vrot.slane %v3064_v57, %v4283_v13  ;;  %v5066_v50 = vrot.slane %v3065_v11, %v4283_v13  ;;  %v3095_v29 = vcombine.high %v5055_v2, %v5055_v2  ;;  %v1277_v27 = vcombine.high %v1275_v4, %v1275_v4 }
 0x126   : > { %v1648_v19 = vcombine.low %v1640_v20, %v1647_v17  ;;  %v5071_v26 = vrot.slane %v1275_v4, %v4283_v13  ;;  %v5075_v53 = vrot.slane %v3066_v12, %v4283_v13  ;;  %v5089_v9 = vrot.slane %v1276_v52, %v4283_v13 }
 0x127   : > { %6273 = vst [vmem:[#allocation80_spill] sm:$0xff] %v5063_v6  ;;  %6274 = vst [vmem:[#allocation81_spill] sm:$0xff] %v5066_v50  ;;  %v3096_v17 = vcombine.high %v5063_v6, %v5063_v6  ;;  %v3097_v20 = vcombine.high %v5066_v50, %v5066_v50  ;;  %v5086_v11 = vrot.slane %v3095_v29, %v4287_v22 }
 0x128   : > { %6275 = vst [vmem:[#allocation82_spill] sm:$0xff] %v5071_v26  ;;  %1904 = vxpose.xlu0.b32.cont [2/16] (narrow) %v1648_v19, 8  ;;  %6276 = vst [vmem:[#allocation83_spill] sm:$0xff] %v5075_v53  ;;  %v5092_v4 = vrot.slane %v1277_v27, %v4283_v13  ;;  %v3098_v19 = vcombine.high %v5075_v53, %v5075_v53  ;;  %v1306_v29 = vcombine.high %v5059_v34, %v5059_v34 }
 0x129   : > { %6277 = vst [vmem:[#allocation84_spill] sm:$0xff] %v5086_v11  ;;  %6278 = vst [vmem:[#allocation85_spill] sm:$0xff] %v5089_v9  ;;  %v5097_v12 = vrot.slane %v3097_v20, %v4287_v22  ;;  %v1307_v52 = vcombine.high %v5071_v26, %v5071_v26  ;;  %v1308_v27 = vcombine.high %v5089_v9, %v5089_v9 }
 0x12a   : > { %6279 = vst [vmem:[#allocation86_spill] sm:$0xff] %v5092_v4  ;;  %v1309_v11 = vcombine.high %v5092_v4, %v5092_v4  ;;  %v5112_v20 = vrot.slane %v3096_v17, %v4287_v22  ;;  %v5115_v21 = vrot.slane %v3098_v19, %v4287_v22  ;;  %v5122_v6 = vrot.slane %v1306_v29, %v4287_v22  ;;  %v2668_v19 = vpop.trf.xlu0  ;;  %v1146_v29 = vpop.trf.xlu1 }
 0x12b   : > { %6280 = vst [vmem:[#allocation87_spill] sm:$0xff] %v5097_v12  ;;  %v5125_v12 = vrot.slane %v1308_v27, %v4287_v22  ;;  %v3114_v57 = vcombine.high %v3106_v49, %v3106_v49  ;;  %v5135_v53 = vrot.slane %v3106_v49, %v4283_v13  ;;  %v5141_v27 = vrot.slane %v3113_v43, %v4283_v13 }
 0x12c   : > { %6281 = vst [vmem:[#allocation88_spill] sm:$0xff] %v5112_v20  ;;  %6282 = vst [vmem:[#allocation89_spill] sm:$0xff] %v5115_v21  ;;  %v5132_v21 = vrot.slane %v1307_v52, %v4287_v22  ;;  %v3115_v20 = vcombine.high %v3113_v43, %v3113_v43  ;;  %v1310_v50 = vcombine.high %v1146_v29, %v1146_v29 }
 0x12d   : > { %6283 = vst [vmem:[#allocation90_spill] sm:$0xff] %v5122_v6  ;;  %6284 = vst [vmem:[#allocation91_spill] sm:$0xff] %v5125_v12  ;;  %v5138_v6 = vrot.slane %v1309_v11, %v4287_v22  ;;  %v1317_v26 = vrot.slane %v1146_v29, %v4283_v13  ;;  %v5145_v17 = vrot.slane %v3114_v57, %v4283_v13 }
 0x12e   : > { %6285 = vst [vmem:[#allocation92_spill] sm:$0xff] %v5132_v21  ;;  %6287 = vst [vmem:[#allocation94_spill] sm:$0xff] %v5141_v27  ;;  %v5148_v52 = vrot.slane %v3115_v20, %v4283_v13  ;;  %v3144_v49 = vcombine.high %v5135_v53, %v5135_v53  ;;  %v2688_v21 = vcombine.high %v2668_v19, %v2668_v19 }
 0x12f   : > { %6286 = vst [vmem:[#allocation93_spill] sm:$0xff] %v5138_v6  ;;  %6288 = vst [vmem:[#allocation95_spill] sm:$0xff] %v5145_v17  ;;  %v3145_v11 = vcombine.high %v5141_v27, %v5141_v27  ;;  %v1324_v6 = vrot.slane %v1310_v50, %v4283_v13  ;;  %v1325_v4 = vcombine.high %v1317_v26, %v1317_v26 }
 0x130   : > { %6289 = vst [vmem:[#allocation96_spill] sm:$0xff] %v5148_v52  ;;  %v3146_v57 = vcombine.high %v5145_v17, %v5145_v17  ;;  %v3147_v20 = vcombine.high %v5148_v52, %v5148_v52  ;;  %v5166_v9 = vrot.slane %v3144_v49, %v4287_v22  ;;  %v5171_v42 = vrot.slane %v1317_v26, %v4283_v13 }
 0x131   : > { %v1326_v50 = vcombine.high %v1324_v6, %v1324_v6  ;;  %v5177_v58 = vrot.slane %v3145_v11, %v4287_v22  ;;  %v5180_v29 = vrot.slane %v1324_v6, %v4283_v13  ;;  %v5183_v12 = vrot.slane %v1325_v4, %v4283_v13 }
 0x132   : > { %6290 = vst [vmem:[#allocation97_spill] sm:$0xff] %v5166_v9  ;;  %v5174_v39 = vrot.slane %v3146_v57, %v4287_v22  ;;  %v5186_v49 = vrot.slane %v3147_v20, %v4287_v22  ;;  %v1355_v26 = vcombine.high %v5171_v42, %v5171_v42  ;;  %v2695_v57 = vrot.slane %v2668_v19, %v4283_v13 }
 0x133   : > { %6292 = vst [vmem:[#allocation99_spill] sm:$0xff] %v5177_v58  ;;  %6293 = vst [vmem:[#allocation100_spill] sm:$0xff] %v5180_v29  ;;  %v5189_v43 = vrot.slane %v1326_v50, %v4283_v13  ;;  %v1356_v11 = vcombine.high %v5180_v29, %v5180_v29  ;;  %v1357_v6 = vcombine.high %v5183_v12, %v5183_v12 }
 0x134   : > { %6291 = vst [vmem:[#allocation98_spill] sm:$0xff] %v5174_v39  ;;  %6294 = vst [vmem:[#allocation101_spill] sm:$0xff] %v5183_v12  ;;  %v5205_v58 = vrot.slane %v1355_v26, %v4287_v22  ;;  %v2702_v52 = vrot.slane %v2688_v21, %v4283_v13  ;;  %v2703_v39 = vcombine.high %v2695_v57, %v2695_v57  ;;  %v2669_v12 = vpop.trf.xlu0 }
 0x135   : > { %6295 = vst [vmem:[#allocation102_spill] sm:$0xff] %v5186_v49  ;;  %6296 = vst [vmem:[#allocation103_spill] sm:$0xff] %v5189_v43  ;;  %v879_v49 = vpop.trf.xlu1  ;;  %v1358_v50 = vcombine.high %v5189_v43, %v5189_v43  ;;  %v5211_v27 = vrot.slane %v1357_v6, %v4287_v22  ;;  %v5216_v20 = vrot.slane %v2695_v57, %v4283_v13 }
 0x136   : > { %6297 = vst [vmem:[#allocation104_spill] sm:$0xff] %v5205_v58  ;;  %v5219_v9 = vrot.slane %v1356_v11, %v4287_v22  ;;  %v2704_v26 = vcombine.high %v2702_v52, %v2702_v52  ;;  %v5222_v58 = vrot.slane %v2702_v52, %v4283_v13  ;;  %v899_v19 = vcombine.high %v879_v49, %v879_v49 }
 0x137   : > { %6298 = vst [vmem:[#allocation105_spill] sm:$0xff] %v5211_v27  ;;  %v5225_v21 = vrot.slane %v1358_v50, %v4287_v22  ;;  %v5228_v6 = vrot.slane %v2703_v39, %v4283_v13  ;;  %v906_v57 = vrot.slane %v879_v49, %v4283_v13  ;;  %v6301_v11 = vrot.slane %v4829_v1, %v4287_v22 }
 0x138   : > { %6299 = vst [vmem:[#allocation106_spill] sm:$0xff] %v5219_v9  ;;  %v5234_v43 = vrot.slane %v2704_v26, %v4283_v13  ;;  %v913_v50 = vrot.slane %v899_v19, %v4283_v13  ;;  %v2744_v49 = vrot.slane %v2669_v12, %v4283_v13  ;;  %v6302_v1 = vrot.slane %v4891_v24, %v4287_v22  ;;  %v2670_v14 = vpop.trf.xlu0 }
 0x139   : > { %6300 = vst [vmem:[#allocation107_spill] sm:$0xff] %v5225_v21  ;;  %v5241_v52 = vsel %vm830_vm0, %v5216_v20, %v6301_v11  ;;  %v2737_v21 = vcombine.high %v2669_v12, %v2669_v12  ;;  %v914_v9 = vcombine.high %v906_v57, %v906_v57  ;;  %v5247_v4 = vrot.slane %v906_v57, %v4283_v13  ;;  %v880_v26 = vpop.trf.xlu1 }
 0x13a   : > { %v915_v29 = vcombine.high %v913_v50, %v913_v50  ;;  %v5253_v11 = vrot.slane %v913_v50, %v4283_v13  ;;  %v2752_v12 = vcombine.high %v2744_v49, %v2744_v49  ;;  %v5274_v27 = vrot.slane %v2744_v49, %v4283_v13 }
 0x13b   : > { %v2751_v19 = vrot.slane %v2737_v21, %v4283_v13  ;;  %v5259_v39 = vrot.slane %v914_v9, %v4283_v13  ;;  %v5271_v50 = vsel %vm830_vm0, %v5247_v4, %v6302_v1  ;;  %v948_v45 = vcombine.high %v880_v26, %v880_v26 }
 0x13c   : > { %v5264_v17 = vrot.slane %v915_v29, %v4283_v13  ;;  %6303 = vst [vmem:[#allocation108_spill] sm:$0xff] %v5274_v27  ;;  %v5282_v29 = vrot.slane %v2752_v12, %v4283_v13  ;;  %v6307_v12 = vrot.slane %v4945_v63, %v4287_v22  ;;  %v955_v24 = vrot.slane %v880_v26, %v4283_v13 }
 0x13d   : > { %v2753_v21 = vcombine.high %v2751_v19, %v2751_v19  ;;  %v5279_v57 = vrot.slane %v2751_v19, %v4283_v13  ;;  %v962_v1 = vrot.slane %v948_v45, %v4283_v13  ;;  %v881_v31 = vpop.trf.xlu1  ;;  %v2786_v28 = vcombine.high %v2670_v14, %v2670_v14 }
 0x13e   : > { %6305 = vst [vmem:[#allocation110_spill] sm:$0xff] %v5282_v29  ;;  %v5300_v41 = vsel %vm830_vm0, %v5274_v27, %v6307_v12  ;;  %v2793_v19 = vrot.slane %v2670_v14, %v4283_v13  ;;  %v5310_v15 = vrot.slane %v955_v24, %v4283_v13 }
 0x13f   : > { %6304 = vst [vmem:[#allocation109_spill] sm:$0xff] %v5279_v57  ;;  %v5289_v49 = vrot.slane %v2753_v21, %v4283_v13  ;;  %6308 = vst [vmem:[#allocation112_spill] sm:$0xff] %v5300_v41  ;;  %v963_v57 = vcombine.high %v955_v24, %v955_v24  ;;  %v964_v63 = vcombine.high %v962_v1, %v962_v1 }
 0x140   : > { %v5313_v12 = vrot.slane %v962_v1, %v4283_v13  ;;  %v2800_v45 = vrot.slane %v2786_v28, %v4283_v13  ;;  %v2801_v26 = vcombine.high %v2793_v19, %v2793_v19  ;;  %v5317_v41 = vrot.slane %v2793_v19, %v4283_v13 }
 0x141   : > { %6306 = vst [vmem:[#allocation111_spill] sm:$0xff] %v5289_v49  ;;  %v997_v21 = vcombine.high %v881_v31, %v881_v31  ;;  %v5320_v9 = vrot.slane %v963_v57, %v4283_v13  ;;  %v5323_v14 = vrot.slane %v964_v63, %v4283_v13  ;;  %v1004_v49 = vrot.slane %v881_v31, %v4283_v13  ;;  %v2671_v57 = vpop.trf.xlu0 }
 0x142   : > { %6309 = vst [vmem:[#allocation113_spill] sm:$0xff] %v5313_v12  ;;  %6310 = vst [vmem:[#allocation114_spill] sm:$0xff] %v5317_v41  ;;  %v2802_v28 = vcombine.high %v2800_v45, %v2800_v45  ;;  %v5331_v27 = vrot.slane %v2800_v45, %v4283_v13  ;;  %v5334_v19 = vrot.slane %v2801_v26, %v4283_v13 }
 0x143   : > { %6311 = vst [vmem:[#allocation115_spill] sm:$0xff] %v5323_v14  ;;  %v6313_v31 = vrot.slane %v4979_v61, %v4287_v22  ;;  %v6315_v63 = vrot.slane %v5055_v2, %v4287_v22  ;;  %v1011_v61 = vrot.slane %v997_v21, %v4283_v13  ;;  %v1012_v14 = vcombine.high %v1004_v49, %v1004_v49 }
 0x144   : > { %6312 = vst [vmem:[#allocation116_spill] sm:$0xff] %v5331_v27  ;;  %v5350_v26 = vrot.slane %v2802_v28, %v4283_v13  ;;  %v5363_v12 = vrot.slane %v1004_v49, %v4283_v13  ;;  %v2835_v45 = vcombine.high %v2671_v57, %v2671_v57  ;;  %v2842_v28 = vrot.slane %v2671_v57, %v4283_v13 }
 0x145   : > { %v5345_v1 = vsel %vm830_vm0, %v5310_v15, %v6313_v31  ;;  %v5359_v29 = vsel %vm830_vm0, %v5317_v41, %v6315_v63  ;;  %v882_v31 = vpop.trf.xlu1  ;;  %v1013_v27 = vcombine.high %v1011_v61, %v1011_v61  ;;  %v5371_v63 = vrot.slane %v1011_v61, %v4283_v13 }
 0x146   : > { %6314 = vst [vmem:[#allocation117_spill] sm:$0xff] %v5350_v26  ;;  %6316 = vst [vmem:[#allocation118_spill] sm:$0xff] %v5359_v29  ;;  %v5374_v21 = vrot.slane %v1012_v14, %v4283_v13  ;;  %v2849_v29 = vrot.slane %v2835_v45, %v4283_v13  ;;  %v1046_v41 = vcombine.high %v882_v31, %v882_v31 }
 0x147   : > { %6317 = vst [vmem:[#allocation119_spill] sm:$0xff] %v5371_v63  ;;  %v5380_v57 = vrot.slane %v1013_v27, %v4283_v13  ;;  %v6318_v24 = vrot.slane %v5059_v34, %v4287_v22  ;;  %v2850_v61 = vcombine.high %v2842_v28, %v2842_v28  ;;  %v5390_v14 = vrot.slane %v2842_v28, %v4283_v13 }
 0x148   : > { %v2851_v26 = vcombine.high %v2849_v29, %v2849_v29  ;;  %v5395_v45 = vrot.slane %v2849_v29, %v4283_v13  ;;  %v1053_v27 = vrot.slane %v882_v31, %v4283_v13  ;;  %v6321_v29 = vrot.slane %v5135_v53, %v4287_v22 }
 0x149   : > { %v5387_v2 = vsel %vm830_vm0, %v5363_v12, %v6318_v24  ;;  %v1060_v34 = vrot.slane %v1046_v41, %v4283_v13 }
 0x14a   : > { %6319 = vst [vmem:[#allocation120_spill] sm:$0xff] %v5387_v2  ;;  %6320 = vst [vmem:[#allocation121_spill] sm:$0xff] %v5395_v45  ;;  %v5403_v2 = vrot.slane %v2850_v61, %v4283_v13  ;;  %v5408_v49 = vrot.slane %v2851_v26, %v4283_v13  ;;  %v5415_v31 = vsel %vm830_vm0, %v5390_v14, %v6321_v29 }
 0x14b   : > { %6322 = vst [vmem:[#allocation122_spill] sm:$0xff] %v5415_v31  ;;  %v1061_v63 = vcombine.high %v1053_v27, %v1053_v27  ;;  %v5423_v28 = vrot.slane %v1053_v27, %v4283_v13  ;;  %v6323_v26 = vrot.slane %v4846_v32, %v4287_v22  ;;  %v1062_v29 = vcombine.high %v1060_v34, %v1060_v34 }
 0x14c   : > { %v5431_v31 = vrot.slane %v1060_v34, %v4283_v13  ;;  %v6324_v61 = vcombine.high %v5216_v20, %v5216_v20  ;;  %v6325_v34 = vcombine.high %v5228_v6, %v5228_v6  ;;  %v6326_v20 = vrot.slane %v5171_v42, %v4287_v22 }
 0x14d   : > { %v3309_v53 = vsel %vm830_vm0, %v5228_v6, %v6323_v26  ;;  %v5434_v41 = vrot.slane %v1061_v63, %v4283_v13  ;;  %v1091_v32 = vcombine.high %v5423_v28, %v5423_v28  ;;  %v5452_v45 = vrot.slane %v1062_v29, %v4283_v13 }
 0x14e   : > { %v3310_v27 = vsel %vm830_vm0, %v6324_v61, %v4868_v46  ;;  %v3311_v26 = vsel %vm830_vm0, %v6325_v34, %v4875_v37  ;;  %v3438_v63 = vcombine.low %v5241_v52, %v3309_v53  ;;  %v1092_v46 = vcombine.high %v5431_v31, %v5431_v31 }
 0x14f   : > { %v5461_v61 = vsel %vm830_vm0, %v5423_v28, %v6326_v20  ;;  %v3439_v24 = vcombine.low %v3310_v27, %v3311_v26  ;;  %v1093_v6 = vcombine.high %v5434_v41, %v5434_v41  ;;  %v6327_v37 = vrot.slane %v4907_v0, %v4287_v22 }
 0x150   : > { %v6328_v53 = vcombine.high %v5247_v4, %v5247_v4  ;;  %v6329_v29 = vcombine.high %v5259_v39, %v5259_v39  ;;  %v3446_v34 = vrot.slane %v3438_v63, %v4311_v38 }
 0x151   : > { %v1520_v52 = vsel %vm830_vm0, %v5259_v39, %v6327_v37  ;;  %v3453_v26 = vrot.slane %v3439_v24, %v4311_v38  ;;  %v6330_v37 = vrot.slane %v4841_v47, %v4287_v22 }
 0x152   : > { %v1521_v42 = vsel %vm830_vm0, %v6328_v53, %v4931_v56  ;;  %v1522_v27 = vsel %vm830_vm0, %v6329_v29, %v4938_v5  ;;  %v1649_v0 = vcombine.low %v5271_v50, %v1520_v52  ;;  %v6331_v56 = vrot.slane %v4849_v3, %v4287_v22 }
 0x153   : > { %v1650_v20 = vcombine.low %v1521_v42, %v1522_v27  ;;  %v3312_v4 = vsel %vm830_vm0, %v5222_v58, %v6330_v37  ;;  %v6332_v5 = vcombine.high %v5222_v58, %v5222_v58  ;;  %v6333_v50 = vcombine.high %v5234_v43, %v5234_v43 }
 0x154   : > { %v3313_v39 = vsel %vm830_vm0, %v5234_v43, %v6331_v56  ;;  %v3454_v63 = vcombine.low %v3446_v34, %v3453_v26  ;;  %v1657_v52 = vrot.slane %v1649_v0, %v4311_v38  ;;  %v6334_v29 = vrot.slane %v4894_v55, %v4287_v22 }
 0x155   : > { %v3314_v24 = vsel %vm830_vm0, %v6332_v5, %v4878_v62  ;;  %v3315_v47 = vsel %vm830_vm0, %v6333_v50, %v4917_v51  ;;  %v1664_v3 = vrot.slane %v1650_v20, %v4311_v38  ;;  %v3455_v53 = vcombine.low %v3312_v4, %v3313_v39 }
 0x156   : > { %v3456_v42 = vcombine.low %v3314_v24, %v3315_v47  ;;  %v1523_v58 = vsel %vm830_vm0, %v5253_v11, %v6334_v29  ;;  %v6335_v62 = vrot.slane %v4910_v59, %v4287_v22  ;;  %v6336_v51 = vcombine.high %v5253_v11, %v5253_v11  ;;  %3694 = vxpose.xlu1.b32.cont [3/16] (narrow) %v3454_v63, 8 }
 0x157   : > { %v1665_v34 = vcombine.low %v1657_v52, %v1664_v3  ;;  %v3463_v26 = vrot.slane %v3455_v53, %v4311_v38  ;;  %v6337_v55 = vcombine.high %v5264_v17, %v5264_v17  ;;  %v6338_v4 = vrot.slane %v4366_v10, %v4287_v22 }
 0x158   : > { %v1524_v43 = vsel %vm830_vm0, %v5264_v17, %v6335_v62  ;;  %v1525_v27 = vsel %vm830_vm0, %v6336_v51, %v4941_v16  ;;  %v3470_v20 = vrot.slane %v3456_v42, %v4311_v38  ;;  %v6339_v11 = vcombine.high %v4363_v8, %v4363_v8  ;;  %v6345_v42 = vld [vmem:[#allocation8_spill] sm:$0xff] }
 0x159   : > { %v1526_v0 = vsel %vm830_vm0, %v6337_v55, %v4949_v33  ;;  %v1666_v59 = vcombine.low %v1523_v58, %v1524_v43  ;;  %v2629_v16 = vsel %vm830_vm0, %v4385_v23, %v6338_v4  ;;  %1905 = vxpose.xlu0.b32.cont [3/16] (narrow) %v1665_v34, 8  ;;  %v6340_v33 = vcombine.high %v4385_v23, %v4385_v23  ;;  %v6347_v58 = vld [vmem:[#allocation9_spill] sm:$0xff]  ;;  %v6350_v43 = vld [vmem:[#allocation11_spill] sm:$0xff] }
 0x15a   : > { %v1667_v37 = vcombine.low %v1525_v27, %v1526_v0  ;;  %v2630_v56 = vsel %vm830_vm0, %v6339_v11, %v4390_v25  ;;  %v3472_v10 = vcombine.low %v4414_v48, %v2629_v16  ;;  %v6341_v5 = vrot.slane %v4650_v40, %v4287_v22  ;;  %v6355_v16 = vld [vmem:[#allocation38_spill] sm:$0xff] }
 0x15b   : > { %v1674_v17 = vrot.slane %v1666_v59, %v4311_v38  ;;  %v2631_v39 = vsel %vm830_vm0, %v6340_v33, %v4398_v30  ;;  %v3471_v8 = vcombine.low %v3463_v26, %v3470_v20  ;;  %v6342_v47 = vcombine.high %v4639_v54, %v4639_v54  ;;  %v6352_v59 = vld [vmem:[#allocation36_spill] sm:$0xff] }
 0x15c   : > { %v840_v24 = vsel %vm830_vm0, %v4674_v36, %v6341_v5  ;;  %v1681_v25 = vrot.slane %v1667_v37, %v4311_v38  ;;  %v3473_v50 = vcombine.low %v2630_v56, %v2631_v39  ;;  %v3480_v30 = vrot.slane %v3472_v10, %v4311_v38  ;;  %v6354_v37 = vld [vmem:[#allocation37_spill] sm:$0xff]  ;;  %v6357_v56 = vld [vmem:[#allocation39_spill] sm:$0xff]  ;;  %v6358_v33 = vld [vmem:[#allocation40_spill] sm:$0xff] }
 0x15d   : > { %v841_v23 = vsel %vm830_vm0, %v6342_v47, %v4671_v35  ;;  %v6343_v48 = vcombine.high %v4674_v36, %v4674_v36  ;;  %v1683_v63 = vcombine.low %v4710_v44, %v840_v24  ;;  %v6344_v52 = vrot.slane %v4360_v7, %v4287_v22  ;;  %3695 = vxpose.xlu1.b32.cont [4/16] (narrow) %v3471_v8, 8  ;;  %v6348_v44 = vld [vmem:[#allocation10_spill] sm:$0xff]  ;;  %v6360_v5 = vld [vmem:[#allocation41_spill] sm:$0xff] }
 0x15e   : > { %v1682_v54 = vcombine.low %v1674_v17, %v1681_v25  ;;  %v3487_v35 = vrot.slane %v3473_v50, %v4311_v38  ;;  %v6346_v29 = vrot.slane %v6345_v42, %v4287_v22  ;;  %v6349_v7 = vcombine.high %v4376_v18, %v4376_v18 }
 0x15f   : > { %v842_v40 = vsel %vm830_vm0, %v6343_v48, %v4682_v60  ;;  %v2632_v3 = vsel %vm830_vm0, %v4376_v18, %v6344_v52  ;;  %v1691_v60 = vrot.slane %v1683_v63, %v4311_v38  ;;  %v6351_v51 = vcombine.high %v6347_v58, %v6347_v58  ;;  %v6365_v52 = vld [vmem:[#allocation69_spill] sm:$0xff] }
 0x160   : > { %v1684_v53 = vcombine.low %v841_v23, %v842_v40  ;;  %v2633_v36 = vsel %vm830_vm0, %v6347_v58, %v6346_v29  ;;  %v2634_v62 = vsel %vm830_vm0, %v6349_v7, %v6348_v44  ;;  %1906 = vxpose.xlu0.b32.cont [4/16] (narrow) %v1682_v54, 8  ;;  %v3488_v26 = vcombine.low %v3480_v30, %v3487_v35  ;;  %v6362_v30 = vld [vmem:[#allocation67_spill] sm:$0xff]  ;;  %v6364_v40 = vld [vmem:[#allocation110_spill] sm:$0xff]  ;;  %v6370_v58 = vld [vmem:[#allocation72_spill] sm:$0xff] }
 0x161   : > { %v2635_v27 = vsel %vm830_vm0, %v6351_v51, %v6350_v43  ;;  %v3489_v34 = vcombine.low %v2632_v3, %v2633_v36  ;;  %v6353_v20 = vrot.slane %v6352_v59, %v4287_v22  ;;  %v6356_v11 = vrot.slane %v6355_v16, %v4287_v22  ;;  %v6366_v3 = vld [vmem:[#allocation108_spill] sm:$0xff] }
 0x162   : > { %v1698_v55 = vrot.slane %v1684_v53, %v4311_v38  ;;  %v3490_v0 = vcombine.low %v2634_v62, %v2635_v27  ;;  %v6359_v39 = vcombine.high %v6354_v37, %v6354_v37  ;;  %v6361_v24 = vcombine.high %v6357_v56, %v6357_v56  ;;  %3696 = vxpose.xlu1.b32.cont [5/16] (narrow) %v3488_v26, 8  ;;  %v6368_v53 = vld [vmem:[#allocation74_spill] sm:$0xff]  ;;  %v6372_v43 = vld [vmem:[#allocation112_spill] sm:$0xff] }
 0x163   : > { %v843_v18 = vsel %vm830_vm0, %v6354_v37, %v6353_v20  ;;  %v3497_v4 = vrot.slane %v3489_v34, %v4311_v38  ;;  %v844_v17 = vsel %vm830_vm0, %v6357_v56, %v6356_v11  ;;  %v6363_v48 = vrot.slane %v6362_v30, %v4287_v22  ;;  %v6373_v34 = vld [vmem:[#allocation76_spill] sm:$0xff]  ;;  %v6377_v11 = vld [vmem:[#allocation66_spill] sm:$0xff] }
 0x164   : > { %v845_v10 = vsel %vm830_vm0, %v6359_v39, %v6358_v33  ;;  %v846_v8 = vsel %vm830_vm0, %v6361_v24, %v6360_v5  ;;  %v1699_v25 = vcombine.low %v1691_v60, %v1698_v55  ;;  %v3504_v50 = vrot.slane %v3490_v0, %v4311_v38  ;;  %v6375_v0 = vld [vmem:[#allocation78_spill] sm:$0xff]  ;;  %v6382_v5 = vld [vmem:[#allocation111_spill] sm:$0xff] }
 0x165   : > { %v1700_v47 = vcombine.low %v843_v18, %v844_v17  ;;  %v1701_v23 = vcombine.low %v845_v10, %v846_v8  ;;  %v3317_v63 = vsel %vm830_vm0, %v6364_v40, %v6363_v48  ;;  %v6367_v54 = vcombine.high %v6366_v3, %v6366_v3  ;;  %v6379_v17 = vld [vmem:[#allocation109_spill] sm:$0xff]  ;;  %v6383_v24 = vld [vmem:[#allocation71_spill] sm:$0xff] }
 0x166   : > { %v6369_v42 = vcombine.high %v6364_v40, %v6364_v40  ;;  %v6371_v36 = vrot.slane %v6370_v58, %v4287_v22  ;;  %1907 = vxpose.xlu0.b32.cont [5/16] (narrow) %v1699_v25, 8  ;;  %v3505_v44 = vcombine.low %v3497_v4, %v3504_v50  ;;  %v3506_v51 = vcombine.low %v6372_v43, %v3317_v63  ;;  %v6387_v40 = vld [vmem:[#allocation70_spill] sm:$0xff]  ;;  %v6395_v43 = vld [vmem:[#allocation79_spill] sm:$0xff] }
 0x167   : > { %v3318_v35 = vsel %vm830_vm0, %v6367_v54, %v6365_v52  ;;  %v1708_v7 = vrot.slane %v1700_v47, %v4311_v38  ;;  %v1715_v62 = vrot.slane %v1701_v23, %v4311_v38  ;;  %v6374_v26 = vcombine.high %v5310_v15, %v5310_v15  ;;  %v6385_v47 = vld [vmem:[#allocation75_spill] sm:$0xff]  ;;  %v6389_v52 = vld [vmem:[#allocation113_spill] sm:$0xff] }
 0x168   : > { %v3319_v29 = vsel %vm830_vm0, %v6369_v42, %v6368_v53  ;;  %v1528_v60 = vsel %vm830_vm0, %v5320_v9, %v6371_v36  ;;  %v6376_v59 = vcombine.high %v5320_v9, %v5320_v9  ;;  %3697 = vxpose.xlu1.b32.cont [6/16] (narrow) %v3505_v44, 8  ;;  %v3514_v4 = vrot.slane %v3506_v51, %v4311_v38  ;;  %v6380_v9 = vld [vmem:[#allocation68_spill] sm:$0xff]  ;;  %v6390_v53 = vld [vmem:[#allocation73_spill] sm:$0xff] }
 0x169   : > { %v3507_v27 = vcombine.low %v3318_v35, %v3319_v29  ;;  %v1529_v55 = vsel %vm830_vm0, %v6374_v26, %v6373_v34  ;;  %v1717_v37 = vcombine.low %v5345_v1, %v1528_v60  ;;  %v1716_v18 = vcombine.low %v1708_v7, %v1715_v62  ;;  %v6392_v29 = vld [vmem:[#allocation115_spill] sm:$0xff]  ;;  %v6393_v36 = vld [vmem:[#allocation77_spill] sm:$0xff] }
 0x16a   : > { %v1530_v20 = vsel %vm830_vm0, %v6376_v59, %v6375_v0  ;;  %v6378_v56 = vrot.slane %v6377_v11, %v4287_v22  ;;  %v6381_v10 = vrot.slane %v6380_v9, %v4287_v22  ;;  %v6384_v8 = vcombine.high %v6379_v17, %v6379_v17  ;;  %v6397_v0 = vld [vmem:[#allocation13_spill] sm:$0xff] }
 0x16b   : > { %v1718_v16 = vcombine.low %v1529_v55, %v1530_v20  ;;  %v3521_v33 = vrot.slane %v3507_v27, %v4311_v38  ;;  %v1725_v39 = vrot.slane %v1717_v37, %v4311_v38  ;;  %1908 = vxpose.xlu0.b32.cont [6/16] (narrow) %v1716_v18, 8  ;;  %v6386_v23 = vcombine.high %v6382_v5, %v6382_v5  ;;  %v6399_v20 = vld [vmem:[#allocation20_spill] sm:$0xff]  ;;  %v6400_v18 = vld [vmem:[#allocation15_spill] sm:$0xff] }
 0x16c   : > { %v3320_v15 = vsel %vm830_vm0, %v6379_v17, %v6378_v56  ;;  %v3321_v1 = vsel %vm830_vm0, %v6382_v5, %v6381_v10  ;;  %v3322_v25 = vsel %vm830_vm0, %v6384_v8, %v6383_v24  ;;  %v6388_v63 = vrot.slane %v6387_v40, %v4287_v22  ;;  %v6403_v17 = vld [vmem:[#allocation19_spill] sm:$0xff]  ;;  %v6406_v10 = vld [vmem:[#allocation44_spill] sm:$0xff] }
 0x16d   : > { %v1732_v50 = vrot.slane %v1718_v16, %v4311_v38  ;;  %v3323_v30 = vsel %vm830_vm0, %v6386_v23, %v6385_v47  ;;  %v3523_v48 = vcombine.low %v3320_v15, %v3321_v1  ;;  %v3522_v54 = vcombine.low %v3514_v4, %v3521_v33  ;;  %v6401_v4 = vld [vmem:[#allocation17_spill] sm:$0xff]  ;;  %v6408_v1 = vld [vmem:[#allocation48_spill] sm:$0xff]  ;;  %v6409_v47 = vld [vmem:[#allocation47_spill] sm:$0xff] }
 0x16e   : > { %v1531_v3 = vsel %vm830_vm0, %v6389_v52, %v6388_v63  ;;  %v3524_v35 = vcombine.low %v3322_v25, %v3323_v30  ;;  %v6391_v42 = vrot.slane %v6390_v53, %v4287_v22  ;;  %v6394_v60 = vcombine.high %v6389_v52, %v6389_v52  ;;  %v6410_v23 = vld [vmem:[#allocation42_spill] sm:$0xff]  ;;  %v6415_v53 = vld [vmem:[#allocation12_spill] sm:$0xff] }
 0x16f   : > { %v1733_v7 = vcombine.low %v1725_v39, %v1732_v50  ;;  %v3531_v62 = vrot.slane %v3523_v48, %v4311_v38  ;;  %v6396_v51 = vcombine.high %v6392_v29, %v6392_v29  ;;  %3698 = vxpose.xlu1.b32.cont [7/16] (narrow) %v3522_v54, 8  ;;  %v6398_v59 = vrot.slane %v6397_v0, %v4287_v22  ;;  %v6405_v39 = vld [vmem:[#allocation23_spill] sm:$0xff]  ;;  %v6412_v63 = vld [vmem:[#allocation50_spill] sm:$0xff]  ;;  %v6423_v0 = vld [vmem:[#allocation21_spill] sm:$0xff] }
 0x170   : > { %v1532_v58 = vsel %vm830_vm0, %v6392_v29, %v6391_v42  ;;  %v1533_v44 = vsel %vm830_vm0, %v6394_v60, %v6393_v36  ;;  %v3538_v26 = vrot.slane %v3524_v35, %v4311_v38  ;;  %v6402_v16 = vcombine.high %v6401_v4, %v6401_v4  ;;  %v6414_v54 = vld [vmem:[#allocation54_spill] sm:$0xff] }
 0x171   : > { %v1534_v27 = vsel %vm830_vm0, %v6396_v51, %v6395_v43  ;;  %v1734_v34 = vcombine.low %v1531_v3, %v1532_v58  ;;  %v2637_v37 = vsel %vm830_vm0, %v6399_v20, %v6398_v59  ;;  %1909 = vxpose.xlu0.b32.cont [7/16] (narrow) %v1733_v7, 8  ;;  %v6404_v15 = vcombine.high %v6399_v20, %v6399_v20  ;;  %v6417_v29 = vld [vmem:[#allocation18_spill] sm:$0xff] }
 0x172   : > { %v1735_v55 = vcombine.low %v1533_v44, %v1534_v27  ;;  %v2638_v11 = vsel %vm830_vm0, %v6402_v16, %v6400_v18  ;;  %v3540_v9 = vcombine.low %v6405_v39, %v2637_v37  ;;  %v6407_v5 = vrot.slane %v6406_v10, %v4287_v22  ;;  %v6418_v7 = vld [vmem:[#allocation14_spill] sm:$0xff]  ;;  %v6430_v10 = vld [vmem:[#allocation49_spill] sm:$0xff] }
 0x173   : > { %v1742_v56 = vrot.slane %v1734_v34, %v4311_v38  ;;  %v2639_v33 = vsel %vm830_vm0, %v6404_v15, %v6403_v17  ;;  %v3539_v8 = vcombine.low %v3531_v62, %v3538_v26  ;;  %v6411_v30 = vcombine.high %v6410_v23, %v6410_v23  ;;  %v6420_v43 = vld [vmem:[#allocation22_spill] sm:$0xff]  ;;  %v6421_v34 = vld [vmem:[#allocation16_spill] sm:$0xff]  ;;  %v6427_v17 = vld [vmem:[#allocation45_spill] sm:$0xff] }
 0x174   : > { %v848_v24 = vsel %vm830_vm0, %v6408_v1, %v6407_v5  ;;  %v1749_v25 = vrot.slane %v1735_v55, %v4311_v38  ;;  %v3541_v50 = vcombine.low %v2638_v11, %v2639_v33  ;;  %v3548_v40 = vrot.slane %v3540_v9, %v4311_v38  ;;  %v6425_v11 = vld [vmem:[#allocation43_spill] sm:$0xff]  ;;  %v6428_v39 = vld [vmem:[#allocation46_spill] sm:$0xff] }
 0x175   : > { %v849_v48 = vsel %vm830_vm0, %v6411_v30, %v6409_v47  ;;  %v6413_v52 = vcombine.high %v6408_v1, %v6408_v1  ;;  %v1751_v35 = vcombine.low %v6414_v54, %v848_v24  ;;  %v6416_v42 = vrot.slane %v6415_v53, %v4287_v22  ;;  %3699 = vxpose.xlu1.b32.cont [8/16] (narrow) %v3539_v8, 8  ;;  %v6431_v1 = vld [vmem:[#allocation51_spill] sm:$0xff]  ;;  %v6437_v54 = vld [vmem:[#allocation84_spill] sm:$0xff] }
 0x176   : > { %v1750_v36 = vcombine.low %v1742_v56, %v1749_v25  ;;  %v3555_v60 = vrot.slane %v3541_v50, %v4311_v38  ;;  %v6419_v62 = vrot.slane %v6418_v7, %v4287_v22  ;;  %v6422_v26 = vcombine.high %v6417_v29, %v6417_v29  ;;  %v6433_v25 = vld [vmem:[#allocation52_spill] sm:$0xff] }
 0x177   : > { %v850_v3 = vsel %vm830_vm0, %v6413_v52, %v6412_v63  ;;  %v2640_v58 = vsel %vm830_vm0, %v6417_v29, %v6416_v42  ;;  %v1759_v27 = vrot.slane %v1751_v35, %v4311_v38  ;;  %v6424_v59 = vcombine.high %v6420_v43, %v6420_v43  ;;  %v6435_v63 = vld [vmem:[#allocation81_spill] sm:$0xff]  ;;  %v6438_v35 = vld [vmem:[#allocation114_spill] sm:$0xff]  ;;  %v6440_v29 = vld [vmem:[#allocation87_spill] sm:$0xff] }
 0x178   : > { %v1752_v44 = vcombine.low %v849_v48, %v850_v3  ;;  %v2641_v51 = vsel %vm830_vm0, %v6420_v43, %v6419_v62  ;;  %v2642_v55 = vsel %vm830_vm0, %v6422_v26, %v6421_v34  ;;  %1910 = vxpose.xlu0.b32.cont [8/16] (narrow) %v1750_v36, 8  ;;  %v3556_v18 = vcombine.low %v3548_v40, %v3555_v60  ;;  %v6442_v60 = vld [vmem:[#allocation85_spill] sm:$0xff] }
 0x179   : > { %v2643_v20 = vsel %vm830_vm0, %v6424_v59, %v6423_v0  ;;  %v3557_v37 = vcombine.low %v2640_v58, %v2641_v51  ;;  %v6426_v56 = vrot.slane %v6425_v11, %v4287_v22  ;;  %v6429_v9 = vrot.slane %v6428_v39, %v4287_v22  ;;  %v6447_v59 = vld [vmem:[#allocation91_spill] sm:$0xff] }
 0x17a   : > { %v1766_v4 = vrot.slane %v1752_v44, %v4311_v38  ;;  %v3558_v16 = vcombine.low %v2642_v55, %v2643_v20  ;;  %v6432_v24 = vcombine.high %v6427_v17, %v6427_v17  ;;  %v6434_v50 = vcombine.high %v6430_v10, %v6430_v10  ;;  %3700 = vxpose.xlu1.b32.cont [9/16] (narrow) %v3556_v18, 8  ;;  %v6445_v55 = vld [vmem:[#allocation90_spill] sm:$0xff]  ;;  %v6449_v18 = vld [vmem:[#allocation120_spill] sm:$0xff] }
 0x17b   : > { %v851_v15 = vsel %vm830_vm0, %v6427_v17, %v6426_v56  ;;  %v3565_v33 = vrot.slane %v3557_v37, %v4311_v38  ;;  %v852_v5 = vsel %vm830_vm0, %v6430_v10, %v6429_v9  ;;  %v6436_v52 = vrot.slane %v6435_v63, %v4287_v22  ;;  %v6450_v17 = vld [vmem:[#allocation80_spill] sm:$0xff] }
 0x17c   : > { %v853_v8 = vsel %vm830_vm0, %v6432_v24, %v6431_v1  ;;  %v854_v47 = vsel %vm830_vm0, %v6434_v50, %v6433_v25  ;;  %v1767_v23 = vcombine.low %v1759_v27, %v1766_v4  ;;  %v3572_v30 = vrot.slane %v3558_v16, %v4311_v38  ;;  %v6444_v27 = vld [vmem:[#allocation118_spill] sm:$0xff]  ;;  %v6456_v24 = vld [vmem:[#allocation88_spill] sm:$0xff] }
 0x17d   : > { %v1768_v48 = vcombine.low %v851_v15, %v852_v5  ;;  %v1769_v40 = vcombine.low %v853_v8, %v854_v47  ;;  %v3325_v3 = vsel %vm830_vm0, %v5334_v19, %v6436_v52  ;;  %v6439_v53 = vcombine.high %v6438_v35, %v6438_v35  ;;  %v6455_v5 = vld [vmem:[#allocation117_spill] sm:$0xff]  ;;  %v6462_v52 = vld [vmem:[#allocation119_spill] sm:$0xff] }
 0x17e   : > { %v6441_v58 = vcombine.high %v5334_v19, %v5334_v19  ;;  %v6443_v44 = vrot.slane %v6442_v60, %v4287_v22  ;;  %1911 = vxpose.xlu0.b32.cont [9/16] (narrow) %v1767_v23, 8  ;;  %v3573_v62 = vcombine.low %v3565_v33, %v3572_v30  ;;  %v3574_v34 = vcombine.low %v6444_v27, %v3325_v3  ;;  %v6452_v33 = vld [vmem:[#allocation116_spill] sm:$0xff]  ;;  %v6458_v47 = vld [vmem:[#allocation89_spill] sm:$0xff] }
 0x17f   : > { %v3326_v42 = vsel %vm830_vm0, %v6439_v53, %v6437_v54  ;;  %v1776_v43 = vrot.slane %v1768_v48, %v4311_v38  ;;  %v1783_v51 = vrot.slane %v1769_v40, %v4311_v38  ;;  %v6446_v19 = vcombine.high %v5363_v12, %v5363_v12  ;;  %v6460_v40 = vld [vmem:[#allocation82_spill] sm:$0xff] }
 0x180   : > { %v3327_v36 = vsel %vm830_vm0, %v6441_v58, %v6440_v29  ;;  %v1536_v7 = vsel %vm830_vm0, %v5374_v21, %v6443_v44  ;;  %v6448_v20 = vcombine.high %v5374_v21, %v5374_v21  ;;  %3701 = vxpose.xlu1.b32.cont [10/16] (narrow) %v3573_v62, 8  ;;  %v3582_v11 = vrot.slane %v3574_v34, %v4311_v38  ;;  %v6453_v21 = vld [vmem:[#allocation83_spill] sm:$0xff]  ;;  %v6463_v53 = vld [vmem:[#allocation86_spill] sm:$0xff]  ;;  %v6465_v58 = vld [vmem:[#allocation92_spill] sm:$0xff] }
 0x181   : > { %v3575_v26 = vcombine.low %v3326_v42, %v3327_v36  ;;  %v1537_v0 = vsel %vm830_vm0, %v6446_v19, %v6445_v55  ;;  %v1785_v4 = vcombine.low %v6449_v18, %v1536_v7  ;;  %v1784_v16 = vcombine.low %v1776_v43, %v1783_v51  ;;  %v6467_v62 = vld [vmem:[#allocation93_spill] sm:$0xff] }
 0x182   : > { %v1538_v37 = vsel %vm830_vm0, %v6448_v20, %v6447_v59  ;;  %v6451_v15 = vrot.slane %v6450_v17, %v4287_v22  ;;  %v6454_v10 = vrot.slane %v6453_v21, %v4287_v22  ;;  %v6457_v8 = vcombine.high %v6452_v33, %v6452_v33  ;;  %v6469_v55 = vld [vmem:[#allocation25_spill] sm:$0xff]  ;;  %v6472_v20 = vld [vmem:[#allocation27_spill] sm:$0xff] }
 0x183   : > { %v1786_v56 = vcombine.low %v1537_v0, %v1538_v37  ;;  %v3589_v39 = vrot.slane %v3575_v26, %v4311_v38  ;;  %v1793_v9 = vrot.slane %v1785_v4, %v4311_v38  ;;  %1912 = vxpose.xlu0.b32.cont [10/16] (narrow) %v1784_v16, 8  ;;  %v6459_v23 = vcombine.high %v6455_v5, %v6455_v5  ;;  %v6471_v0 = vld [vmem:[#allocation33_spill] sm:$0xff]  ;;  %v6475_v16 = vld [vmem:[#allocation30_spill] sm:$0xff]  ;;  %v6477_v17 = vld [vmem:[#allocation35_spill] sm:$0xff] }
 0x184   : > { %v3328_v12 = vsel %vm830_vm0, %v6452_v33, %v6451_v15  ;;  %v3329_v1 = vsel %vm830_vm0, %v6455_v5, %v6454_v10  ;;  %v3330_v25 = vsel %vm830_vm0, %v6457_v8, %v6456_v24  ;;  %v6461_v63 = vrot.slane %v6460_v40, %v4287_v22  ;;  %v6473_v37 = vld [vmem:[#allocation29_spill] sm:$0xff]  ;;  %v6478_v33 = vld [vmem:[#allocation55_spill] sm:$0xff]  ;;  %v6482_v24 = vld [vmem:[#allocation60_spill] sm:$0xff] }
 0x185   : > { %v1800_v50 = vrot.slane %v1786_v56, %v4311_v38  ;;  %v3331_v30 = vsel %vm830_vm0, %v6459_v23, %v6458_v47  ;;  %v3591_v48 = vcombine.low %v3328_v12, %v3329_v1  ;;  %v3590_v54 = vcombine.low %v3582_v11, %v3589_v39  ;;  %v6480_v39 = vld [vmem:[#allocation62_spill] sm:$0xff]  ;;  %v6481_v1 = vld [vmem:[#allocation57_spill] sm:$0xff] }
 0x186   : > { %v1539_v3 = vsel %vm830_vm0, %v6462_v52, %v6461_v63  ;;  %v3592_v35 = vcombine.low %v3330_v25, %v3331_v30  ;;  %v6464_v42 = vrot.slane %v6463_v53, %v4287_v22  ;;  %v6466_v36 = vcombine.high %v6462_v52, %v6462_v52  ;;  %v6484_v47 = vld [vmem:[#allocation58_spill] sm:$0xff]  ;;  %v6487_v63 = vld [vmem:[#allocation24_spill] sm:$0xff] }
 0x187   : > { %v1801_v44 = vcombine.low %v1793_v9, %v1800_v50  ;;  %v3599_v7 = vrot.slane %v3591_v48, %v4311_v38  ;;  %v6468_v43 = vcombine.high %v5380_v57, %v5380_v57  ;;  %3702 = vxpose.xlu1.b32.cont [11/16] (narrow) %v3590_v54, 8  ;;  %v6470_v19 = vrot.slane %v6469_v55, %v4287_v22  ;;  %v6486_v48 = vld [vmem:[#allocation65_spill] sm:$0xff] }
 0x188   : > { %v1540_v29 = vsel %vm830_vm0, %v5380_v57, %v6464_v42  ;;  %v1541_v60 = vsel %vm830_vm0, %v6466_v36, %v6465_v58  ;;  %v3606_v34 = vrot.slane %v3592_v35, %v4311_v38  ;;  %v6474_v18 = vcombine.high %v6473_v37, %v6473_v37  ;;  %v6492_v36 = vld [vmem:[#allocation34_spill] sm:$0xff]  ;;  %v6499_v37 = vld [vmem:[#allocation61_spill] sm:$0xff] }
 0x189   : > { %v1542_v51 = vsel %vm830_vm0, %v6468_v43, %v6467_v62  ;;  %v1802_v27 = vcombine.low %v1539_v3, %v1540_v29  ;;  %v2645_v59 = vsel %vm830_vm0, %v6471_v0, %v6470_v19  ;;  %1913 = vxpose.xlu0.b32.cont [11/16] (narrow) %v1801_v44, 8  ;;  %v6476_v11 = vcombine.high %v6471_v0, %v6471_v0  ;;  %v6489_v3 = vld [vmem:[#allocation31_spill] sm:$0xff]  ;;  %v6490_v29 = vld [vmem:[#allocation26_spill] sm:$0xff] }
 0x18a   : > { %v1803_v26 = vcombine.low %v1541_v60, %v1542_v51  ;;  %v2646_v4 = vsel %vm830_vm0, %v6474_v18, %v6472_v20  ;;  %v3608_v15 = vcombine.low %v6477_v17, %v2645_v59  ;;  %v6479_v12 = vrot.slane %v6478_v33, %v4287_v22  ;;  %v6495_v51 = vld [vmem:[#allocation32_spill] sm:$0xff]  ;;  %v6497_v59 = vld [vmem:[#allocation53_spill] sm:$0xff]  ;;  %v6503_v17 = vld [vmem:[#allocation59_spill] sm:$0xff] }
 0x18b   : > { %v1810_v57 = vrot.slane %v1802_v27, %v4311_v38  ;;  %v2647_v56 = vsel %vm830_vm0, %v6476_v11, %v6475_v16  ;;  %v3607_v21 = vcombine.low %v3599_v7, %v3606_v34  ;;  %v6483_v8 = vcombine.high %v6482_v24, %v6482_v24  ;;  %v6493_v7 = vld [vmem:[#allocation28_spill] sm:$0xff]  ;;  %v6507_v24 = vld [vmem:[#allocation95_spill] sm:$0xff] }
 0x18c   : > { %v856_v9 = vsel %vm830_vm0, %v6480_v39, %v6479_v12  ;;  %v1817_v10 = vrot.slane %v1803_v26, %v4311_v38  ;;  %v3609_v5 = vcombine.low %v2646_v4, %v2647_v56  ;;  %v3616_v50 = vrot.slane %v3608_v15, %v4311_v38  ;;  %v6502_v11 = vld [vmem:[#allocation64_spill] sm:$0xff]  ;;  %v6505_v12 = vld [vmem:[#allocation63_spill] sm:$0xff] }
 0x18d   : > { %v857_v25 = vsel %vm830_vm0, %v6483_v8, %v6481_v1  ;;  %v6485_v23 = vcombine.high %v6480_v39, %v6480_v39  ;;  %v1819_v40 = vcombine.low %v6486_v48, %v856_v9  ;;  %v6488_v52 = vrot.slane %v6487_v63, %v4287_v22  ;;  %3703 = vxpose.xlu1.b32.cont [12/16] (narrow) %v3607_v21, 8  ;;  %v6513_v63 = vld [vmem:[#allocation101_spill] sm:$0xff] }
 0x18e   : > { %v1818_v35 = vcombine.low %v1810_v57, %v1817_v10  ;;  %v3623_v53 = vrot.slane %v3609_v5, %v4311_v38  ;;  %v6491_v58 = vrot.slane %v6490_v29, %v4287_v22  ;;  %v6494_v62 = vcombine.high %v6489_v3, %v6489_v3  ;;  %v6500_v57 = vld [vmem:[#allocation56_spill] sm:$0xff] }
 0x18f   : > { %v858_v30 = vsel %vm830_vm0, %v6485_v23, %v6484_v47  ;;  %v2648_v54 = vsel %vm830_vm0, %v6489_v3, %v6488_v52  ;;  %v1827_v44 = vrot.slane %v1819_v40, %v4311_v38  ;;  %v6496_v27 = vcombine.high %v6492_v36, %v6492_v36 }
 0x190   : > { %v1820_v42 = vcombine.low %v857_v25, %v858_v30  ;;  %v2649_v60 = vsel %vm830_vm0, %v6492_v36, %v6491_v58  ;;  %v2650_v43 = vsel %vm830_vm0, %v6494_v62, %v6493_v7  ;;  %1914 = vxpose.xlu0.b32.cont [12/16] (narrow) %v1818_v35, 8  ;;  %v3624_v55 = vcombine.low %v3616_v50, %v3623_v53  ;;  %v6509_v50 = vld [vmem:[#allocation97_spill] sm:$0xff]  ;;  %v6511_v30 = vld [vmem:[#allocation98_spill] sm:$0xff]  ;;  %v6516_v58 = vld [vmem:[#allocation104_spill] sm:$0xff] }
 0x191   : > { %v2651_v34 = vsel %vm830_vm0, %v6496_v27, %v6495_v51  ;;  %v3625_v26 = vcombine.low %v2648_v54, %v2649_v60  ;;  %v6498_v20 = vrot.slane %v6497_v59, %v4287_v22  ;;  %v6501_v16 = vrot.slane %v6500_v57, %v4287_v22  ;;  %v6515_v53 = vld [vmem:[#allocation122_spill] sm:$0xff]  ;;  %v6517_v36 = vld [vmem:[#allocation105_spill] sm:$0xff] }
 0x192   : > { %v1834_v19 = vrot.slane %v1820_v42, %v4311_v38  ;;  %v3626_v0 = vcombine.low %v2650_v43, %v2651_v34  ;;  %v6504_v15 = vcombine.high %v6499_v37, %v6499_v37  ;;  %v6506_v39 = vcombine.high %v6502_v11, %v6502_v11  ;;  %3704 = vxpose.xlu1.b32.cont [13/16] (narrow) %v3624_v55, 8  ;;  %v6518_v27 = vld [vmem:[#allocation94_spill] sm:$0xff] }
 0x193   : > { %v859_v18 = vsel %vm830_vm0, %v6499_v37, %v6498_v20  ;;  %v3633_v4 = vrot.slane %v3625_v26, %v4311_v38  ;;  %v860_v56 = vsel %vm830_vm0, %v6502_v11, %v6501_v16  ;;  %v6508_v8 = vrot.slane %v6507_v24, %v4287_v22  ;;  %v6521_v26 = vld [vmem:[#allocation96_spill] sm:$0xff]  ;;  %v6525_v37 = vld [vmem:[#allocation102_spill] sm:$0xff] }
 0x194   : > { %v861_v33 = vsel %vm830_vm0, %v6504_v15, %v6503_v17  ;;  %v862_v9 = vsel %vm830_vm0, %v6506_v39, %v6505_v12  ;;  %v1835_v21 = vcombine.low %v1827_v44, %v1834_v19  ;;  %v3640_v10 = vrot.slane %v3626_v0, %v4311_v38  ;;  %v6523_v0 = vld [vmem:[#allocation99_spill] sm:$0xff] }
 0x195   : > { %v1836_v5 = vcombine.low %v859_v18, %v860_v56  ;;  %v1837_v1 = vcombine.low %v861_v33, %v862_v9  ;;  %v3333_v25 = vsel %vm830_vm0, %v5403_v2, %v6508_v8  ;;  %v6510_v47 = vcombine.high %v5390_v14, %v5390_v14  ;;  %v6527_v56 = vld [vmem:[#allocation100_spill] sm:$0xff]  ;;  %v6529_v33 = vld [vmem:[#allocation103_spill] sm:$0xff] }
 0x196   : > { %v6512_v48 = vcombine.high %v5403_v2, %v5403_v2  ;;  %v6514_v52 = vrot.slane %v6513_v63, %v4287_v22  ;;  %1915 = vxpose.xlu0.b32.cont [13/16] (narrow) %v1835_v21, 8  ;;  %v3641_v54 = vcombine.low %v3633_v4, %v3640_v10  ;;  %v3642_v42 = vcombine.low %v6515_v53, %v3333_v25  ;;  %v6531_v21 = vld [vmem:[#allocation106_spill] sm:$0xff]  ;;  %v6532_v10 = vld [vmem:[#allocation107_spill] sm:$0xff] }
 0x197   : > { %v3334_v23 = vsel %vm830_vm0, %v6510_v47, %v6509_v50  ;;  %v1844_v35 = vrot.slane %v1836_v5, %v4311_v38  ;;  %v1851_v14 = vrot.slane %v1837_v1, %v4311_v38  ;;  %v1545_v2 = vsel %vm830_vm0, %v1091_v32, %v6516_v58 }
 0x198   : > { %v3335_v40 = vsel %vm830_vm0, %v6512_v48, %v6511_v30  ;;  %v1544_v3 = vsel %vm830_vm0, %v5434_v41, %v6514_v52  ;;  %v1546_v60 = vsel %vm830_vm0, %v1093_v6, %v6517_v36  ;;  %v1094_v7 = vcombine.high %v5452_v45, %v5452_v45  ;;  %3705 = vxpose.xlu1.b32.cont [14/16] (narrow) %v3641_v54, 8  ;;  %v6520_v41 = vld [vmem:[#allocation121_spill] sm:$0xff] }
 0x199   : > { %v3643_v29 = vcombine.low %v3334_v23, %v3335_v40  ;;  %v1853_v44 = vcombine.low %v5461_v61, %v1544_v3  ;;  %v1852_v62 = vcombine.low %v1844_v35, %v1851_v14  ;;  %v3650_v43 = vrot.slane %v3642_v42, %v4311_v38 }
 0x19a   : > { %v1854_v51 = vcombine.low %v1545_v2, %v1546_v60  ;;  %v6519_v34 = vrot.slane %v6518_v27, %v4287_v22  ;;  %v6522_v61 = vrot.slane %v6521_v26, %v4287_v22  ;;  %v6524_v59 = vcombine.high %v6520_v41, %v6520_v41 }
 0x19b   : > { %v3657_v28 = vrot.slane %v3643_v29, %v4311_v38  ;;  %v1861_v32 = vrot.slane %v1853_v44, %v4311_v38  ;;  %1916 = vxpose.xlu0.b32.cont [14/16] (narrow) %v1852_v62, 8  ;;  %v6526_v18 = vcombine.high %v5408_v49, %v5408_v49  ;;  %v6528_v17 = vrot.slane %v6527_v56, %v4287_v22 }
 0x19c   : > { %v3336_v6 = vsel %vm830_vm0, %v6520_v41, %v6519_v34  ;;  %v3337_v55 = vsel %vm830_vm0, %v5408_v49, %v6522_v61  ;;  %v1868_v19 = vrot.slane %v1854_v51, %v4311_v38  ;;  %v3338_v20 = vsel %vm830_vm0, %v6524_v59, %v6523_v0 }
 0x19d   : > { %v3339_v4 = vsel %vm830_vm0, %v6526_v18, %v6525_v37  ;;  %v3659_v57 = vcombine.low %v3336_v6, %v3337_v55  ;;  %v3658_v16 = vcombine.low %v3650_v43, %v3657_v28  ;;  %v1547_v15 = vsel %vm830_vm0, %v5431_v31, %v6528_v17 }
 0x19e   : > { %v3660_v11 = vcombine.low %v3338_v20, %v3339_v4  ;;  %v6530_v12 = vrot.slane %v6529_v33, %v4287_v22  ;;  %v1869_v9 = vcombine.low %v1861_v32, %v1868_v19  ;;  %v1549_v49 = vsel %vm830_vm0, %v1092_v46, %v6531_v21 }
 0x19f   : > { %v1550_v5 = vsel %vm830_vm0, %v1094_v7, %v6532_v10  ;;  %3706 = vxpose.xlu1.b32.cont [15/16] (narrow) %v3658_v16, 8  ;;  %v3667_v24 = vrot.slane %v3659_v57, %v4311_v38 }
 0x1a0   : > { %v1548_v39 = vsel %vm830_vm0, %v5452_v45, %v6530_v12  ;;  %v3674_v8 = vrot.slane %v3660_v11, %v4311_v38  ;;  %v1871_v25 = vcombine.low %v1549_v49, %v1550_v5  ;;  %1917 = vxpose.xlu0.b32.cont [15/16] (narrow) %v1869_v9, 8 }
 0x1a1   : > { %v1870_v1 = vcombine.low %v1547_v15, %v1548_v39 }
 0x1a2   : > { %v3675_v50 = vcombine.low %v3667_v24, %v3674_v8  ;;  %v1885_v47 = vrot.slane %v1871_v25, %v4311_v38 }
 0x1a3   : > { %v1878_v45 = vrot.slane %v1870_v1, %v4311_v38 }
 0x1a4   : > { %3707 = vxpose.xlu1.b32.end [16/16] (narrow) %v3675_v50, 8 }
 0x1a5   : > { %v1886_v31 = vcombine.low %v1878_v45, %v1885_v47 }
 0x1a7   : > { %1918 = vxpose.xlu0.b32.end [16/16] (narrow) %v1886_v31, 8 }
 0x1e8   : > { %v3708_v46 = vpop.trf.xlu1 }
 0x1e9   : > { %v3731_v23 = vrot.slane %v3708_v46, %v4283_v13 }
 0x1eb   : > { %v1919_v30 = vpop.trf.xlu0  ;;  %v3732_v48 = vcombine.high %v3731_v23, %v3731_v23  ;;  %v3739_v40 = vrot.slane %v3731_v23, %v4283_v13 }
 0x1ec   : > { %v1942_v63 = vrot.slane %v1919_v30, %v4283_v13 }
 0x1ed   : > { %v3746_v52 = vrot.slane %v3732_v48, %v4283_v13  ;;  %v3747_v3 = vcombine.high %v3739_v40, %v3739_v40  ;;  %v3752_v54 = vrot.slane %v3739_v40, %v4287_v22 }
 0x1ee   : > { %v1943_v35 = vcombine.high %v1942_v63, %v1942_v63  ;;  %v1950_v14 = vrot.slane %v1942_v63, %v4283_v13 }
 0x1ef   : > { %v3748_v53 = vcombine.high %v3746_v52, %v3746_v52  ;;  %v3756_v42 = vrot.slane %v3746_v52, %v4287_v22  ;;  %v3760_v29 = vrot.slane %v3747_v3, %v4287_v22 }
 0x1f0   : > { %v1957_v58 = vrot.slane %v1943_v35, %v4283_v13  ;;  %v1958_v2 = vcombine.high %v1950_v14, %v1950_v14  ;;  %v3769_v44 = vsel %vm830_vm0, %v1950_v14, %v3752_v54 }
 0x1f1   : > { %v3764_v36 = vrot.slane %v3748_v53, %v4287_v22 }
 0x1f2   : > { %v1959_v60 = vcombine.high %v1957_v58, %v1957_v58  ;;  %v3770_v7 = vsel %vm830_vm0, %v1957_v58, %v3756_v42  ;;  %v3771_v43 = vsel %vm830_vm0, %v1958_v2, %v3760_v29 }
 0x1f3   : > { %v3777_v62 = vcombine.low %v3769_v44, %v3770_v7 }
 0x1f4   : > { %v3772_v51 = vsel %vm830_vm0, %v1959_v60, %v3764_v36 }
 0x1f5   : > { %v3778_v28 = vcombine.low %v3771_v43, %v3772_v51  ;;  %v3785_v13 = vrot.slane %v3777_v62, %v4311_v38 }
 0x1f7   : > { %v3792_v22 = vrot.slane %v3778_v28, %v4311_v38 }
 0x1f9   : > { %v3793_v32 = vcombine.low %v3785_v13, %v3792_v22 }
 0x1fb   : > { %3795 = vst [vmem:[%s164_s23] sm:$0xff] %v3793_v32 }
 0x1fc   : > { %4046 = shalt.err (!%p4043_p3)
}
 0x1fd   : > { %s4047_s20 = scalar_lea.hbm %s6030_s4, 128  ;;  %s4051_s30 = scalar_lea.hbm %s6085_s1, 512 }
 0x1fe   : > { %p4048_p5 = scmp.ne.s32.totalorder %s6030_s4, %s4047_s20  ;;  %p4052_p2 = scmp.lt.u32.totalorder %s6030_s4, %s6085_s1 }
 0x1ff   : > { %p4053_p4 = scmp.lt.u32.totalorder %s4051_s30, %s4047_s20  ;;  %p4055_p8 = scmp.lt.u32.totalorder %s4047_s20, %s6030_s4 }
 0x200   : > { %p4049_p6 = pnand %p4048_p5, %p6533_p9 }
 0x201   : > { %p4054_p10 = por %p4053_p4, %p4052_p2 }
 0x202   : > { %p4050_p7 = pneg %p4049_p6 }
 0x203   : > { %p4056_p12 = por %p4055_p8, %p4054_p10 }
 0x205   : > { %p4057_p0 = pnand %p4056_p12, %p4050_p7 }
 0x207   : > { %4060 = shalt.err (!%p4057_p0)
}
 0x208   : > { %3922 = dma.vmem_to_hbm [thread:$0]  (%p6533_p9), %s6032_s10, 128, %s6030_s4, %s3797_s9  }
 0x209 PF: > { %p3933_p11 = scmp.ge.s32.totalorder %s4131_s13, 2  ;;  %s3825_s14 = sand.u32 1, %s4103_s6  }
 0x20a   : > { %p6534_p13 = scmp.ne.s32.totalorder %s6183_s25, 0  ;;  %s3826_s18 = scalar_lea.sflag [#allocation4], %s3825_s14 }
 0x20c   : > { %p3929_p1 = pnand %p3933_p11, %p6534_p13 }
 0x20e   : > { %4098 = dma.done.wait (!%p3929_p1), %s3826_s18, 128  }
 0x20f   : > { %4100 = vsyncadd (!%p3929_p1), %s3826_s18, 4294967168  ;;  %s17_s13 = sadd.s32 1, %s4131_s13   ;;  %s6535_s6 = smov %s4107_s7 }
 0x210   : > { %p14_p3 = scmp.ge.s32.totalorder %s17_s13, 6   ;;  %s6536_s7 = smov %s4111_s8 }
 0x211   : > { %s6537_s8 = smov %s4227_s27  ;;  %s6538_s9 = smov %s4123_s11 }
 0x212   : > { %s6539_s10 = smov %s4127_s12  ;;  %s6540_s11 = smov %s6543_s16 }
 0x213   : > { %s6541_s12 = smov %s6547_s17  ;;  %16 = sbr.rel (!%p14_p3) target bundleno = 7 (0x7), region = 69 }
 0x21a   :  { %3831 = vsyncpa [#allocation3], 1 }
 0x21b   :  { %3833 = vsyncpa [#allocation3 + $0x1], 1 }
 0x21c   :  { %3834 = vsyncpa [#allocation4], 1 }
 0x21d   :  { %3836 = vsyncpa [#allocation4 + $0x1], 1 }

</bundles_post_ra>
